<compile_context>
chip_gen: v6e
topology: v6e:2x2x1
jax: 0.10.0
libtpu: 0.0.40
codegen_flags: <defaults>
</compile_context>

<pallas_src>
import math

import jax
import jax.numpy as jnp
from jax.experimental import pallas as pl
from jax.experimental.pallas import tpu as pltpu


def _round_up(x, k):
    return ((x + k - 1) // k) * k


def _make_flash_kernel(scale, needs_mask, mxu_dtype):
    """Flash-attention body. Grid = (batch, query tiles, KV tiles)."""

    def kernel(*refs):
        if needs_mask:
            q_ref, kt_ref, v_ref, bias_ref, o_ref, m_ref, l_ref, acc_ref = refs
        else:
            q_ref, kt_ref, v_ref, o_ref, m_ref, l_ref, acc_ref = refs

        kv_step = pl.program_id(2)

        @pl.when(kv_step == 0)
        def _init():
            m_ref[...] = jnp.full_like(m_ref, -jnp.inf)
            l_ref[...] = jnp.zeros_like(l_ref)
            acc_ref[...] = jnp.zeros_like(acc_ref)

        # Logits (tile_n, tile_m): operands already in mxu_dtype (bf16 by
        # default -> fast MXU path on v5e/v6e/v7x), f32 accumulation.  K comes
        # in pre-transposed, so this is a plain matmul (no XLU transpose).
        logits = jnp.dot(q_ref[...], kt_ref[...],
                         preferred_element_type=jnp.float32)
        if needs_mask:
            # Additive key-padding bias (0 / -1e30), (1, tile_m) broadcast.
            logits = logits + bias_ref[...]

        # Online (streaming) softmax update - all element-wise math in f32.
        m_prev = m_ref[...]
        m_new = jnp.maximum(m_prev, jnp.max(logits, axis=-1, keepdims=True))
        alpha = jnp.exp(m_prev - m_new)
        p = jnp.exp(logits - m_new)
        l_ref[...] = alpha * l_ref[...] + jnp.sum(p, axis=-1, keepdims=True)
        acc_ref[...] = alpha * acc_ref[...] + jnp.dot(
            p.astype(mxu_dtype), v_ref[...],
            preferred_element_type=jnp.float32)
        m_ref[...] = m_new

        @pl.when(kv_step == pl.num_programs(2) - 1)
        def _finalize():
            # Reference semantics: (softmax(Q K^T) / sqrt(hidden_dim)) @ V.
            # Exact reciprocal (runs once per query tile) with the
            # 1/sqrt(hidden_dim) scale folded in.
            inv = pl.reciprocal(l_ref[...], approx=False) * scale
            o_ref[...] = (acc_ref[...] * inv).astype(o_ref.dtype)
            # Dropout: module evaluated in inference mode -> identity.
            # TODO(synk): training-mode dropout (pltpu.prng_random_bits) not emitted.

    return kernel


def qkv_attention(input_query, input_key, input_value, params, hidden_dim, *,
                  tile_n=512, tile_m=512, mxu_dtype=jnp.bfloat16,
                  out_dtype=None, vmem_limit_mb=32):
    """QKVAttention forward (batched or unbatched).

    params: wq/bq, wk/bk, wv/bv with weights stored (in_features, out_features).
    Inputs may be (n, d) or (B, n, d).  tile_n/tile_m: query / KV tile sizes
    (rounded to 128).  On v5e/v6e raise tile_n (and vmem_limit_mb) for long
    sequences to cut repeated K/V HBM traffic; keep tile_n <= ~1024 on v7x.
    """
    squeeze = input_query.ndim == 2
    if squeeze:
        input_query = input_query[None]
        input_key = input_key[None]
        input_value = input_value[None]

    B, n, _ = input_query.shape
    _, m, _ = input_key.shape
    _, m_v, _ = input_value.shape
    assert m == m_v, "key / value must have the same number of rows"
    h = params["wq"].shape[1]
    out_dim = params["wv"].shape[1]
    out_dtype = input_query.dtype if out_dtype is None else out_dtype

    # ---- Hoisted linear projections (once per tensor, bias fused; done in
    # XLA so they are NOT recomputed per query tile inside the flash loop).
    hi = jax.lax.Precision.HIGHEST
    q_proj = jnp.einsum('bnd,dh->bnh', input_query.astype(jnp.float32),
                        params["wq"].astype(jnp.float32),
                        precision=hi) + params["bq"]
    k_proj = jnp.einsum('bmd,dh->bmh', input_key.astype(jnp.float32),
                        params["wk"].astype(jnp.float32),
                        precision=hi) + params["bk"]
    v_proj = jnp.einsum('bmd,do->bmo', input_value.astype(jnp.float32),
                        params["wv"].astype(jnp.float32),
                        precision=hi) + params["bv"]

    # ---- Lane-dense padded sizes and tiles.
    h_p = _round_up(h, 128)
    o_p = _round_up(out_dim, 128)
    tile_n = min(_round_up(tile_n, 128), _round_up(n, 128))
    tile_m = min(_round_up(tile_m, 128), _round_up(m, 128))
    n_p = _round_up(n, tile_n)
    m_p = _round_up(m, tile_m)

    def pad3(x, rows_p, cols_p):
        out = jnp.zeros((B, rows_p, cols_p), mxu_dtype)
        return out.at[:, :x.shape[1], :x.shape[2]].set(x.astype(mxu_dtype))

    q_pad = pad3(q_proj, n_p, h_p)                        # (B, n_p, h_p)
    kt_pad = pad3(jnp.swapaxes(k_proj, 1, 2), h_p, m_p)   # (B, h_p, m_p)
    v_pad = pad3(v_proj, m_p, o_p)                        # (B, m_p, o_p)

    needs_mask = m_p != m
    grid = (B, n_p // tile_n, m_p // tile_m)
    kernel = _make_flash_kernel(1.0 / math.sqrt(hidden_dim), needs_mask,
                                mxu_dtype)

    in_specs = [
        pl.BlockSpec((None, tile_n, h_p), lambda b, i, j: (b, i, 0)),  # Q tile
        pl.BlockSpec((None, h_p, tile_m), lambda b, i, j: (b, 0, j)),  # K^T tile
        pl.BlockSpec((None, tile_m, o_p), lambda b, i, j: (b, j, 0)),  # V tile
    ]
    operands = [q_pad, kt_pad, v_pad]
    if needs_mask:
        mask_bias = jnp.where(jnp.arange(m_p) < m, 0.0,
                              -1e30).astype(jnp.float32).reshape(1, m_p)
        operands.append(mask_bias)
        in_specs.append(pl.BlockSpec((1, tile_m), lambda b, i, j: (0, j)))

    out_pad = pl.pallas_call(
        kernel,
        out_shape=jax.ShapeDtypeStruct((B, n_p, o_p), out_dtype),
        grid_spec=pltpu.PrefetchScalarGridSpec(
            num_scalar_prefetch=0,
            grid=grid,
            in_specs=in_specs,
            out_specs=pl.BlockSpec((None, tile_n, o_p),
                                   lambda b, i, j: (b, i, 0)),
            scratch_shapes=[
                pltpu.VMEM((tile_n, 1), jnp.float32),    # running max
                pltpu.VMEM((tile_n, 1), jnp.float32),    # running sum
                pltpu.VMEM((tile_n, o_p), jnp.float32),  # output accumulator
            ]),
        compiler_params=pltpu.CompilerParams(
            dimension_semantics=("parallel", "parallel", "arbitrary"),
            # Right-sized (well under v7x's 64 MiB/TC); raise with tile_n on
            # v5e/v6e where 128 MiB VMEM allows much larger query tiles.
            vmem_limit_bytes=vmem_limit_mb * 1024 * 1024),
    )(*operands)

    out = out_pad[:, :n, :out_dim]
    return out[0] if squeeze else out


def self_attention(x, params, hidden_dim, **kw):
    """SelfAttention branch of `Encoder`: QKVAttention(x, x, x), one batched
    pallas_call with the batch as a leading ("parallel") grid axis."""
    return qkv_attention(x, x, x, params, hidden_dim, **kw)


def init_params(key, query_dim, key_dim, value_dim, hidden_dim, output_dim):
    """Deterministic init mimicking nn.Linear (uniform +-1/sqrt(fan_in)).

    Weights stored pre-transposed as (in_features, out_features).
    """
    ks = jax.random.split(key, 6)

    def linear(kw, kb, fan_in, fan_out):
        bound = 1.0 / math.sqrt(fan_in)
        w = jax.random.uniform(kw, (fan_in, fan_out), jnp.float32, -bound, bound)
        b = jax.random.uniform(kb, (fan_out,), jnp.float32, -bound, bound)
        return w, b

    wq, bq = linear(ks[0], ks[1], query_dim, hidden_dim)
    wk, bk = linear(ks[2], ks[3], key_dim, hidden_dim)
    wv, bv = linear(ks[4], ks[5], value_dim, output_dim)
    return dict(wq=wq, bq=bq, wk=wk, bk=bk, wv=wv, bv=bv)


def _reference(q, k, v, params, hidden_dim):
    hi = jax.lax.Precision.HIGHEST
    lq = jnp.dot(q, params["wq"], precision=hi) + params["bq"]
    lk = jnp.dot(k, params["wk"], precision=hi) + params["bk"]
    lv = jnp.dot(v, params["wv"], precision=hi) + params["bv"]
    s = jax.nn.softmax(jnp.dot(lq, lk.T, precision=hi),
                       axis=-1) / math.sqrt(hidden_dim)
    return jnp.dot(s, lv, precision=hi)


if __name__ == "__main__":
    key = jax.random.PRNGKey(0)
    k_x, k_p, k_q2, k_k2, k_v2, k_p2 = jax.random.split(key, 6)

    # --- Test 1: Encoder's SelfAttention branch at module-consistent shapes
    #     (batch=2, seq=8, embed=16, attention hidden/output = 32).
    batch, seq, embed = 2, 8, 16
    attn_hidden, attn_out = 32, 32
    word_tensor = jax.random.normal(k_x, (batch, seq, embed), jnp.float32)
    params = init_params(k_p, embed, embed, embed, attn_hidden, attn_out)
    ref = jnp.stack([_reference(word_tensor[b], word_tensor[b], word_tensor[b],
                                params, attn_hidden) for b in range(batch)])

    attn_f32 = self_attention(word_tensor, params, attn_hidden,
                              mxu_dtype=jnp.float32)
    jax.block_until_ready(attn_f32)
    assert attn_f32.shape == (batch, seq, attn_out)
    assert jnp.allclose(attn_f32, ref, atol=1e-3, rtol=1e-3), "f32 self-attn mismatch"

    attn_bf16 = self_attention(word_tensor, params, attn_hidden)  # bf16 MXU default
    jax.block_until_ready(attn_bf16)
    assert jnp.allclose(attn_bf16, ref, atol=5e-2, rtol=5e-2), "bf16 self-attn mismatch"

    # --- Test 2: multi-tile grid (2 query tiles x 2 KV tiles), padded/masked
    #     keys, rectangular dims; validate f32 and bf16 MXU-operand paths.
    n, m = 160, 200
    dq = dk = 24
    dv = 40
    hidden2, out2 = 32, 48
    q = jax.random.normal(k_q2, (n, dq), jnp.float32)
    k = jax.random.normal(k_k2, (m, dk), jnp.float32)
    v = jax.random.normal(k_v2, (m, dv), jnp.float32)
    params2 = init_params(k_p2, dq, dk, dv, hidden2, out2)
    ref2 = _reference(q, k, v, params2, hidden2)

    out_f32 = qkv_attention(q, k, v, params2, hidden2, tile_n=128, tile_m=128,
                            mxu_dtype=jnp.float32)
    jax.block_until_ready(out_f32)
    assert out_f32.shape == (n, out2)
    assert jnp.allclose(out_f32, ref2, atol=1e-3, rtol=1e-3), "f32 tiled mismatch"

    out_bf16 = qkv_attention(q, k, v, params2, hidden2, tile_n=128, tile_m=128)
    jax.block_until_ready(out_bf16)
    assert jnp.allclose(out_bf16, ref2, atol=5e-2, rtol=5e-2), "bf16 tiled mismatch"

    print("KERNEL_OK")
</pallas_src>

<mosaic_0001>
module attributes {stable_mosaic.version = 11 : i64} {
  func.func @kernel(%arg0: i32, %arg1: i32, %arg2: i32, %arg3: memref<1x128x128xf32, #tpu.memory_space<vmem>>, %arg4: memref<1x128x128xf32, #tpu.memory_space<vmem>>, %arg5: memref<1x128x128xf32, #tpu.memory_space<vmem>>, %arg6: memref<1x128xf32, #tpu.memory_space<vmem>>, %arg7: memref<1x128x128xf32, #tpu.memory_space<vmem>>, %arg8: memref<128x1xf32, #tpu.memory_space<vmem>>, %arg9: memref<128x1xf32, #tpu.memory_space<vmem>>, %arg10: memref<128x128xf32, #tpu.memory_space<vmem>>) attributes {dimension_semantics = [#tpu.dimension_semantics<parallel>, #tpu.dimension_semantics<parallel>, #tpu.dimension_semantics<arbitrary>], iteration_bounds = array<i64: 2, 1, 1>, scalar_prefetch = 0 : i64, scratch_operands = 3 : i64, tpu.core_type = #tpu.core_type<tc>, window_params = [{transform_indices = @transform_0, window_bounds = array<i64: 1, 128, 128>}, {transform_indices = @transform_1, window_bounds = array<i64: 1, 128, 128>}, {transform_indices = @transform_2, window_bounds = array<i64: 1, 128, 128>}, {transform_indices = @transform_3, window_bounds = array<i64: 1, 128>}, {transform_indices = @transform_4, window_bounds = array<i64: 1, 128, 128>}]} {
    %c0_i32 = arith.constant 0 : i32
    %0 = arith.cmpi eq, %arg2, %c0_i32 : i32
    %1 = arith.extui %0 : i1 to i32
    %c0_i32_0 = arith.constant 0 : i32
    %2 = arith.cmpi ne, %1, %c0_i32_0 : i32
    scf.if %2 {
      %cst_28 = arith.constant 0xFF800000 : f32
      %38 = vector.broadcast %cst_28 : f32 to vector<128x1xf32>
      %c0_29 = arith.constant 0 : index
      %c0_30 = arith.constant 0 : index
      %39 = vector.load %arg8[%c0_29, %c0_30] : memref<128x1xf32, #tpu.memory_space<vmem>>, vector<128x1xf32>
      tpu.vector_store %arg8[%c0_29, %c0_30], %38 {strides = array<i32>} : memref<128x1xf32, #tpu.memory_space<vmem>>, vector<128x1xf32>,
      %cst_31 = arith.constant 0.000000e+00 : f32
      %40 = vector.broadcast %cst_31 : f32 to vector<128x1xf32>
      %c0_32 = arith.constant 0 : index
      %c0_33 = arith.constant 0 : index
      %41 = vector.load %arg9[%c0_32, %c0_33] : memref<128x1xf32, #tpu.memory_space<vmem>>, vector<128x1xf32>
      tpu.vector_store %arg9[%c0_32, %c0_33], %40 {strides = array<i32>} : memref<128x1xf32, #tpu.memory_space<vmem>>, vector<128x1xf32>,
      %cst_34 = arith.constant 0.000000e+00 : f32
      %42 = vector.broadcast %cst_34 : f32 to vector<128x128xf32>
      %c0_35 = arith.constant 0 : index
      %c0_36 = arith.constant 0 : index
      %43 = vector.load %arg10[%c0_35, %c0_36] : memref<128x128xf32, #tpu.memory_space<vmem>>, vector<128x128xf32>
      tpu.vector_store %arg10[%c0_35, %c0_36], %42 {strides = array<i32>} : memref<128x128xf32, #tpu.memory_space<vmem>>, vector<128x128xf32>,
    } else {
    }
    %c0 = arith.constant 0 : index
    %c0_1 = arith.constant 0 : index
    %c0_2 = arith.constant 0 : index
    %3 = vector.load %arg3[%c0, %c0_1, %c0_2] : memref<1x128x128xf32, #tpu.memory_space<vmem>>, vector<1x128x128xf32>
    %4 = vector.shape_cast %3 : vector<1x128x128xf32> to vector<128x128xf32>
    %c0_3 = arith.constant 0 : index
    %c0_4 = arith.constant 0 : index
    %c0_5 = arith.constant 0 : index
    %5 = vector.load %arg4[%c0_3, %c0_4, %c0_5] : memref<1x128x128xf32, #tpu.memory_space<vmem>>, vector<1x128x128xf32>
    %6 = vector.shape_cast %5 : vector<1x128x128xf32> to vector<128x128xf32>
    %cst = arith.constant dense<0.000000e+00> : vector<128x128xf32>
    %7 = tpu.matmul %4, %6, %cst {dimension_numbers = #tpu.dot_dimension_numbers<[1], [0], [0], [1], [0, 0, 1, 1], [], []>} : vector<128x128xf32>, vector<128x128xf32>, vector<128x128xf32> -> vector<128x128xf32>
    %c0_6 = arith.constant 0 : index
    %c0_7 = arith.constant 0 : index
    %8 = vector.load %arg6[%c0_6, %c0_7] : memref<1x128xf32, #tpu.memory_space<vmem>>, vector<1x128xf32>
    %9 = vector.broadcast %8 : vector<1x128xf32> to vector<128x128xf32>
    %10 = arith.addf %7, %9 : vector<128x128xf32>
    %c0_8 = arith.constant 0 : index
    %c0_9 = arith.constant 0 : index
    %11 = vector.load %arg8[%c0_8, %c0_9] : memref<128x1xf32, #tpu.memory_space<vmem>>, vector<128x1xf32>
    %cst_10 = arith.constant dense<0xFF800000> : vector<128xf32>
    %12 = vector.multi_reduction <maximumf>, %10, %cst_10 [1] : vector<128x128xf32> to vector<128xf32>
    %13 = vector.shape_cast %12 : vector<128xf32> to vector<128x1xf32>
    %14 = arith.maximumf %11, %13 : vector<128x1xf32>
    %15 = arith.subf %11, %14 : vector<128x1xf32>
    %16 = math.exp %15 : vector<128x1xf32>
    %17 = vector.broadcast %14 : vector<128x1xf32> to vector<128x128xf32>
    %18 = arith.subf %10, %17 : vector<128x128xf32>
    %19 = math.exp %18 : vector<128x128xf32>
    %c0_11 = arith.constant 0 : index
    %c0_12 = arith.constant 0 : index
    %20 = vector.load %arg9[%c0_11, %c0_12] : memref<128x1xf32, #tpu.memory_space<vmem>>, vector<128x1xf32>
    %21 = arith.mulf %16, %20 : vector<128x1xf32>
    %cst_13 = arith.constant dense<0.000000e+00> : vector<128xf32>
    %22 = vector.multi_reduction <add>, %19, %cst_13 [1] : vector<128x128xf32> to vector<128xf32>
    %23 = vector.shape_cast %22 : vector<128xf32> to vector<128x1xf32>
    %24 = arith.addf %21, %23 : vector<128x1xf32>
    %c0_14 = arith.constant 0 : index
    %c0_15 = arith.constant 0 : index
    %25 = vector.load %arg9[%c0_14, %c0_15] : memref<128x1xf32, #tpu.memory_space<vmem>>, vector<128x1xf32>
    tpu.vector_store %arg9[%c0_14, %c0_15], %24 {strides = array<i32>} : memref<128x1xf32, #tpu.memory_space<vmem>>, vector<128x1xf32>,
    %c0_16 = arith.constant 0 : index
    %c0_17 = arith.constant 0 : index
    %26 = vector.load %arg10[%c0_16, %c0_17] : memref<128x128xf32, #tpu.memory_space<vmem>>, vector<128x128xf32>
    %27 = vector.broadcast %16 : vector<128x1xf32> to vector<128x128xf32>
    %28 = arith.mulf %27, %26 : vector<128x128xf32>
    %c0_18 = arith.constant 0 : index
    %c0_19 = arith.constant 0 : index
    %c0_20 = arith.constant 0 : index
    %29 = vector.load %arg5[%c0_18, %c0_19, %c0_20] : memref<1x128x128xf32, #tpu.memory_space<vmem>>, vector<1x128x128xf32>
    %30 = vector.shape_cast %29 : vector<1x128x128xf32> to vector<128x128xf32>
    %cst_21 = arith.constant dense<0.000000e+00> : vector<128x128xf32>
    %31 = tpu.matmul %19, %30, %cst_21 {dimension_numbers = #tpu.dot_dimension_numbers<[1], [0], [0], [1], [0, 0, 1, 1], [], []>} : vector<128x128xf32>, vector<128x128xf32>, vector<128x128xf32> -> vector<128x128xf32>
    %32 = arith.addf %28, %31 : vector<128x128xf32>
    %c0_22 = arith.constant 0 : index
    %c0_23 = arith.constant 0 : index
    %33 = vector.load %arg10[%c0_22, %c0_23] : memref<128x128xf32, #tpu.memory_space<vmem>>, vector<128x128xf32>
    tpu.vector_store %arg10[%c0_22, %c0_23], %32 {strides = array<i32>} : memref<128x128xf32, #tpu.memory_space<vmem>>, vector<128x128xf32>,
    %c0_24 = arith.constant 0 : index
    %c0_25 = arith.constant 0 : index
    %34 = vector.load %arg8[%c0_24, %c0_25] : memref<128x1xf32, #tpu.memory_space<vmem>>, vector<128x1xf32>
    tpu.vector_store %arg8[%c0_24, %c0_25], %14 {strides = array<i32>} : memref<128x1xf32, #tpu.memory_space<vmem>>, vector<128x1xf32>,
    %c0_i32_26 = arith.constant 0 : i32
    %35 = arith.cmpi eq, %arg2, %c0_i32_26 : i32
    %36 = arith.extui %35 : i1 to i32
    %c0_i32_27 = arith.constant 0 : i32
    %37 = arith.cmpi ne, %36, %c0_i32_27 : i32
    scf.if %37 {
      %c0_28 = arith.constant 0 : index
      %c0_29 = arith.constant 0 : index
      %38 = vector.load %arg9[%c0_28, %c0_29] : memref<128x1xf32, #tpu.memory_space<vmem>>, vector<128x1xf32>
      %39 = tpu.reciprocal %38 : vector<128x1xf32> -> vector<128x1xf32>
      %cst_30 = arith.constant 0.176776692 : f32
      %40 = vector.broadcast %cst_30 : f32 to vector<128x1xf32>
      %41 = arith.mulf %39, %40 : vector<128x1xf32>
      %c0_31 = arith.constant 0 : index
      %c0_32 = arith.constant 0 : index
      %42 = vector.load %arg10[%c0_31, %c0_32] : memref<128x128xf32, #tpu.memory_space<vmem>>, vector<128x128xf32>
      %43 = vector.broadcast %41 : vector<128x1xf32> to vector<128x128xf32>
      %44 = arith.mulf %42, %43 : vector<128x128xf32>
      %c0_33 = arith.constant 0 : index
      %c0_34 = arith.constant 0 : index
      %c0_35 = arith.constant 0 : index
      %45 = vector.load %arg7[%c0_33, %c0_34, %c0_35] : memref<1x128x128xf32, #tpu.memory_space<vmem>>, vector<1x128x128xf32>
      %46 = vector.shape_cast %45 : vector<1x128x128xf32> to vector<128x128xf32>
      %47 = vector.shape_cast %44 : vector<128x128xf32> to vector<1x128x128xf32>
      tpu.vector_store %arg7[%c0_33, %c0_34, %c0_35], %47 {strides = array<i32>} : memref<1x128x128xf32, #tpu.memory_space<vmem>>, vector<1x128x128xf32>,
    } else {
    }
    return
  }
  func.func @transform_0(%arg0: i32, %arg1: i32, %arg2: i32) -> (i32, i32, i32) {
    %c0_i32 = arith.constant 0 : i32
    %c0_i32_0 = arith.constant 0 : i32
    return %arg0, %arg1, %c0_i32 : i32, i32, i32
  }
  func.func @transform_1(%arg0: i32, %arg1: i32, %arg2: i32) -> (i32, i32, i32) {
    %c0_i32 = arith.constant 0 : i32
    %c0_i32_0 = arith.constant 0 : i32
    return %arg0, %c0_i32, %arg2 : i32, i32, i32
  }
  func.func @transform_2(%arg0: i32, %arg1: i32, %arg2: i32) -> (i32, i32, i32) {
    %c0_i32 = arith.constant 0 : i32
    %c0_i32_0 = arith.constant 0 : i32
    return %arg0, %arg2, %c0_i32 : i32, i32, i32
  }
  func.func @transform_3(%arg0: i32, %arg1: i32, %arg2: i32) -> (i32, i32) {
    %c0_i32 = arith.constant 0 : i32
    %c0_i32_0 = arith.constant 0 : i32
    return %c0_i32, %arg2 : i32, i32
  }
  func.func @transform_4(%arg0: i32, %arg1: i32, %arg2: i32) -> (i32, i32, i32) {
    %c0_i32 = arith.constant 0 : i32
    %c0_i32_0 = arith.constant 0 : i32
    return %arg0, %arg1, %c0_i32 : i32, i32, i32
  }
}

</mosaic_0001>

<bundles_post_ra>
// kernel: tpu_custom_call.1
= control target key start
LH: loop header
LB: loop body
LE: loop exit
PB: predicated region body
PF: predicated region fallthrough
CT: control target
= control target key end

     0   :  { %s2860_s0 = inlined_call_operand.hbm [shape: f32[2,128,128], index: 0, kind: input, shape index: {}]   ;;  %s2861_s1 = inlined_call_operand.hbm [shape: f32[2,128,128], index: 1, kind: input, shape index: {}]   ;;  %s2862_s2 = inlined_call_operand.hbm [shape: f32[2,128,128], index: 2, kind: input, shape index: {}]   ;;  %s2863_s3 = inlined_call_operand.vmem [shape: f32[1,128], index: 3, kind: input, shape index: {}]   ;;  %s2864_s4 = inlined_call_operand.hbm [shape: f32[2,128,128], index: 4, kind: output, shape index: {}]  }
   0x1   :  { %2871 = sst [smem:[#allocation19_spill]] %s2861_s1 }
   0x2   :  { %9 = vsyncpa [#allocation6], 0 }
   0x3   :  { %11 = vsyncpa [#allocation6 + $0x1], 0 }
   0x4   :  { %12 = vsyncpa [#allocation9], 0 }
   0x5   :  { %14 = vsyncpa [#allocation9 + $0x1], 0 }
   0x6   :  { %15 = vsyncpa [#allocation7], 0 }
   0x7   :  { %17 = vsyncpa [#allocation7 + $0x1], 0  ;;  %s2170_s15 = smov 0   ;;  %s2172_s16 = smov 0  }
   0x8   :  { %s2174_s17 = smov 0   ;;  %s2176_s18 = smov 0  }
   0x9   :  { %s2178_s19 = smov 0   ;;  %s2180_s20 = smov 0  }
   0xa LB: > { %2872 = sst [smem:[#allocation15_spill]] %s2128_s19  ;;  %s2201_s21 = sadd.s32 4294967295, %s2132_s20   ;;  %s2132_s20 = sphi %s2180_s20, %s23_s20   ;;  %s2128_s19 = sphi %s2178_s19, %s2902_s19   ;;  %s2124_s18 = sphi %s2176_s18, %s2901_s18   ;;  %s2120_s17 = sphi %s2174_s17, %s2905_s17   ;;  %s2116_s16 = sphi %s2172_s16, %s2904_s16   ;;  %s2112_s15 = sphi %s2170_s15, %s2903_s15  }
   0xb   : > { %s1583_s22 = sadd.s32 4294967294, %s2132_s20   ;;  %s42_s23 = sadd.s32 1, %s2128_s19 }
   0xc   : > { %s51_s24 = sadd.s32 1, %s2120_s17  ;;  %p44_p0 = scmp.ge.s32.totalorder %s42_s23, 2 }
   0xd   : > { %p58_p1 = scmp.ne.s32.totalorder %s2120_s17, %s2116_s16  ;;  %p59_p2 = scmp.eq.s32.totalorder %s2132_s20, 0 }
   0xe   : > { %p64_p3 = scmp.ne.s32.totalorder %s2116_s16, %s2112_s15  ;;  %s2907_s23 = smov (%p44_p0, %s42_s23), 0 }
   0xf   : > { %2873 = sst [smem:[#allocation16_spill]] %s2907_s23  ;;  %p2213_p4 = por %p59_p2, %p58_p1 }
  0x10   : > { %p65_p5 = scmp.eq.s32.totalorder %s2201_s21, 0  ;;  %s46_s26 = ssub.s32 %s2128_s19, %s2907_s23 }
  0x11   : > { %p172_p6 = scmp.eq.s32.totalorder %s2201_s21, 1  ;;  %p49_p7 = scmp.eq.s32.totalorder %s46_s26, 0 }
  0x12   : > { %p2221_p8 = por %p65_p5, %p64_p3  ;;  %p178_p10 = scmp.eq.s32.totalorder %s1583_s22, 1 }
  0x13   : > { %p2225_p9 = por %p172_p6, %p58_p1  ;;  %p1809_p13 = scmp.lt.s32.totalorder %s2132_s20, 2 }
  0x14   : > { %s2230_s29 = scalar_select %p49_p7, %s2120_s17, %s51_s24  }
  0x15   : > { %p2232_p11 = por %p178_p10, %p64_p3  ;;  %s2865_s5 = sand.u32 1, %s2120_s17  }
  0x16   : > { %2877 = sst [smem:[#allocation17_spill]] %s2230_s29  ;;  %s2241_s6 = sshll.u32 %s2865_s5, 7 }
  0x17   : > { %s2878_s30 = scalar_select %p2232_p11, 1, 0 }
  0x18   : > { %s2244_s7 = sshll.u32 %s2128_s19, 11  ;;  %p2248_p0 = pnand %p1809_p13, %p2213_p4 }
  0x19   : > { %2879 = sst [smem:[#allocation18_spill]] %s2878_s30  ;;  %s227_s9 = sand.u32 1, %s2132_s20  }
  0x1a   : > { %s2881_s1 = sld [smem:[#allocation19_spill]]  ;;  %s231_s13 = scalar_lea.vmem [#allocation8], %s2241_s6 }
  0x1b   : > { %s239_s14 = sshll.u32 %s231_s13, 4  ;;  %p1596_p1 = scmp.ge.s32.totalorder %s2132_s20, 1  ;;  %s240_s14 = int_to_ptr.vmem [resolvable:$true] %s239_s14 }
  0x1c   : > { %p270_p2 = scmp.lt.s32.totalorder %s2132_s20, 3  ;;  %s2260_s22 = scalar_lea.sflag [#allocation9], %s227_s9 }
  0x1d   : > { %p1966_p3 = pneg %p2248_p0  ;;  %s1977_s24 = scalar_lea.vmem %s240_s14, 2048 }
  0x1e   : > { %p1978_p4 = scmp.ne.s32.totalorder %s240_s14, %s1977_s24  ;;  %s2134_s25 = smov [#allocation8]  }
  0x1f   : > { %s1982_s26 = sshll.u32 %s2134_s25, 4  ;;  %s1983_s26 = int_to_ptr.vmem [resolvable:$false] %s1982_s26 }
  0x20   : > { %s238_s12 = scalar_lea.hbm %s2881_s1, %s2244_s7  ;;  %p1980_p5 = pnand %p1978_p4, %p1966_p3 }
  0x21   : > { %s1984_s10 = scalar_lea.vmem %s1983_s26, 4096  ;;  %p1985_p7 = scmp.lt.s32.totalorder %s240_s14, %s1983_s26 }
  0x22   : > { %p1981_p6 = pneg %p1980_p5  ;;  %p1986_p10 = scmp.lt.s32.totalorder %s1984_s10, %s1977_s24 }
  0x24   : > { %p1987_p13 = por %p1986_p10, %p1985_p7 }
  0x26   : > { %p1988_p12 = pnand %p1987_p13, %p1981_p6 }
  0x28   : > { %1991 = shalt.err (!%p1988_p12)
}
  0x29   : > { %s2869_s11 = smov 128   ;;  %s2136_s9 = smov 8  }
  0x2a   : > { %1801 = dma.hbm_to_vmem [thread:$0]  (!%p2248_p0), %s238_s12, 2048, %s240_s14, %s2260_s22, %s2869_s11, %s2869_s11, %s2136_s9  }
  0x2b   : > { %p2277_p4 = pnand %p1596_p1, %p270_p2  ;;  %s216_s26 = scalar_lea.hbm %s2860_s0, %s2244_s7 }
  0x2c   : > { %s208_s10 = scalar_lea.vmem [#allocation5], %s2241_s6  ;;  %s261_s19 = scalar_lea.hbm %s2862_s2, %s2244_s7 }
  0x2d   : > { %s217_s5 = sshll.u32 %s208_s10, 4  ;;  %s2883_s29 = sand.u32 1, %s2120_s17   ;;  %s218_s5 = int_to_ptr.vmem [resolvable:$true] %s217_s5 }
  0x2e   : > { %s205_s30 = scalar_lea.sflag [#allocation6], %s2883_s29  ;;  %s2005_s12 = scalar_lea.vmem %s218_s5, 2048 }
  0x2f   : > { %p2006_p12 = scmp.ne.s32.totalorder %s218_s5, %s2005_s12  ;;  %s2137_s14 = smov [#allocation5]  }
  0x30   : > { %s2010_s11 = sshll.u32 %s2137_s14, 4  ;;  %s2011_s11 = int_to_ptr.vmem [resolvable:$false] %s2010_s11 }
  0x31   : > { %p2008_p1 = pnand %p2006_p12, %p1966_p3  ;;  %s2012_s24 = scalar_lea.vmem %s2011_s11, 4096 }
  0x32   : > { %p2013_p5 = scmp.lt.s32.totalorder %s218_s5, %s2011_s11  ;;  %p2014_p6 = scmp.lt.s32.totalorder %s2012_s24, %s2005_s12 }
  0x33   : > { %p2009_p2 = pneg %p2008_p1 }
  0x34   : > { %p2015_p7 = por %p2014_p6, %p2013_p5 }
  0x36   : > { %p2016_p10 = pnand %p2015_p7, %p2009_p2 }
  0x38   : > { %2019 = shalt.err (!%p2016_p10)
}
  0x39   : > { %s2884_s1 = smov 128   ;;  %s253_s23 = scalar_lea.vmem [#allocation10], %s2241_s6 }
  0x3a   : > { %1798 = dma.hbm_to_vmem [thread:$0]  (!%p2248_p0), %s216_s26, 2048, %s218_s5, %s205_s30, %s2884_s1, %s2884_s1, %s2136_s9  }
  0x3b   : > { %s262_s29 = sshll.u32 %s253_s23, 4  ;;  %s2138_s11 = smov [#allocation10]   ;;  %s263_s29 = int_to_ptr.vmem [resolvable:$true] %s262_s29 }
  0x3c   : > { %s2033_s25 = scalar_lea.vmem %s263_s29, 2048  ;;  %s2038_s10 = sshll.u32 %s2138_s11, 4  ;;  %s2039_s10 = int_to_ptr.vmem [resolvable:$false] %s2038_s10 }
  0x3d   : > { %p2034_p13 = scmp.ne.s32.totalorder %s263_s29, %s2033_s25  ;;  %s2040_s12 = scalar_lea.vmem %s2039_s10, 4096 }
  0x3e   : > { %p2041_p2 = scmp.lt.s32.totalorder %s263_s29, %s2039_s10  ;;  %p2042_p5 = scmp.lt.s32.totalorder %s2040_s12, %s2033_s25 }
  0x3f   : > { %p2036_p12 = pnand %p2034_p13, %p1966_p3 }
  0x40   : > { %p2043_p6 = por %p2042_p5, %p2041_p2 }
  0x41   : > { %p2037_p1 = pneg %p2036_p12 }
  0x43   : > { %p2044_p7 = pnand %p2043_p6, %p2037_p1 }
  0x45   : > { %2047 = shalt.err (!%p2044_p7)
}
  0x46   : > { %1804 = dma.hbm_to_vmem [thread:$0]  (!%p2248_p0), %s261_s19, 2048, %s263_s29, %s2260_s22, %s2884_s1, %s2884_s1, %s2136_s9  }
  0x47   : > { %274 = sbr.rel (%p2277_p4) target bundleno = 940 (0x3ac), region = 36  ;;  %s2318_s6 = sand.u32 (!%p2277_p4), 1, %s2116_s16  }
  0x48   : > { %s2321_s8 = sshll.u32 (!%p2277_p4), %s2318_s6, 7  ;;  %s277_s26 = scalar_lea.sflag (!%p2277_p4), [#allocation6], %s2318_s6 }
  0x49   : > { %s2325_s14 = scalar_lea.vmem (!%p2277_p4), [#allocation5], %s2321_s8 }
  0x4c   : > { %2099 = dma.done.wait (%p2221_p8), %s277_s26, 2048  }
  0x4d   : > { %2101 = vsyncadd (%p2221_p8), %s277_s26, 4294965248  ;;  %s285_s19 = sand.u32 1, %s2201_s21   ;;  %s2333_s22 = scalar_lea.vmem [#allocation8], %s2321_s8 }
  0x4e   : > { %s286_s7 = scalar_lea.sflag [#allocation9], %s285_s19 }
  0x4f   : > { %2103 = dma.done.wait (%p2221_p8), %s286_s7, 4096  }
  0x50   : > { %2105 = vsyncadd (%p2221_p8), %s286_s7, 4294963200  ;;  %v426_v0 = vld [vmem:[%s2333_s22 + $0x78] sm:$0xff]  ;;  %v425_v1 = vld [vmem:[%s2333_s22 + $0x70] sm:$0xff]  ;;  %vm346_vm0 = vcmask 7168   ;;  %v2139_v32 = vmov -inf   ;;  %v2140_v51 = vmov 0  }
  0x51   : > { %1675 = vmatprep.subr.mxu0 %v426_v0  ;;  %v424_v2 = vld [vmem:[%s2333_s22 + $0x68] sm:$0xff]  ;;  %v423_v3 = vld [vmem:[%s2333_s22 + $0x60] sm:$0xff]  ;;  %v422_v5 = vld [vmem:[%s2333_s22 + $0x58] sm:$0xff]  ;;  %347 = vst.msk [vmem:[#allocation2] sm:$0xff] %vm346_vm0, %v2139_v32  ;;  %1866 = vset.pattern.permute.xlu0 %v2140_v51  ;;  %s2473_s9 = scalar_lea.vmem [#allocation10], %s2321_s8  ;;  %s2782_s13 = scalar_lea.vmem [#allocation11], %s2321_s8 }
  0x52   : > { %1676 = vmatpush3.msra.mxu0 %v426_v0  ;;  %v395_v4 = vld [vmem:[%s2325_s14] sm:$0xff]  ;;  %v421_v6 = vld [vmem:[%s2333_s22 + $0x50] sm:$0xff]  ;;  %v420_v7 = vld [vmem:[%s2333_s22 + $0x48] sm:$0xff]  ;;  %348 = vst.msk [vmem:[#allocation2 + $0x8] sm:$0xff] %vm346_vm0, %v2139_v32  ;;  %1867 = vset.pattern.permute.xlu1 %v2140_v51  ;;  %v2141_v0 = vmov 0.0   ;;  %s1610_s24 = sshll.u32 %s2124_s18, 11 }
  0x53   : > { %1677 = vmatprep.subr.mxu0 %v425_v1  ;;  %1707 = vmatprep.mubr.f32.mxu0 %v395_v4  ;;  %v419_v8 = vld [vmem:[%s2333_s22 + $0x40] sm:$0xff]  ;;  %v418_v9 = vld [vmem:[%s2333_s22 + $0x38] sm:$0xff]  ;;  %v417_v10 = vld [vmem:[%s2333_s22 + $0x30] sm:$0xff]  ;;  %349 = vst.msk [vmem:[#allocation2 + $0x10] sm:$0xff] %vm346_vm0, %v2139_v32  ;;  %s1432_s1 = sshll.u32 %s2782_s13, 4  ;;  %s2809_s25 = scalar_lea.hbm %s2864_s4, %s1610_s24  ;;  %s2811_s1 = int_to_ptr.vmem [resolvable:$true] %s1432_s1 }
  0x54   : > { %1678 = vmatpush3.msra.mxu0 %v425_v1  ;;  %v416_v11 = vld [vmem:[%s2333_s22 + $0x28] sm:$0xff]  ;;  %v415_v12 = vld [vmem:[%s2333_s22 + $0x20] sm:$0xff]  ;;  %v414_v13 = vld [vmem:[%s2333_s22 + $0x18] sm:$0xff]  ;;  %350 = vst.msk [vmem:[#allocation2 + $0x18] sm:$0xff] %vm346_vm0, %v2139_v32  ;;  %s1417_s11 = scalar_lea.sflag [#allocation7], %s2318_s6  ;;  %s2048_s18 = scalar_lea.vmem %s2811_s1, 2048 }
  0x55   : > { %1679 = vmatprep.subr.mxu0 %v424_v2  ;;  %v413_v14 = vld [vmem:[%s2333_s22 + $0x10] sm:$0xff]  ;;  %v412_v15 = vld [vmem:[%s2333_s22 + $0x8] sm:$0xff]  ;;  %v411_v16 = vld [vmem:[%s2333_s22] sm:$0xff]  ;;  %351 = vst.msk [vmem:[#allocation2 + $0x20] sm:$0xff] %vm346_vm0, %v2139_v32  ;;  %p2049_p8 = scmp.ne.s32.totalorder %s2811_s1, %s2048_s18  ;;  %s2142_s10 = smov [#allocation11]  }
  0x56   : > { %1680 = vmatpush3.msra.mxu0 %v424_v2  ;;  %v396_v17 = vld [vmem:[%s2325_s14 + $0x8] sm:$0xff]  ;;  %v397_v18 = vld [vmem:[%s2325_s14 + $0x10] sm:$0xff]  ;;  %v398_v19 = vld [vmem:[%s2325_s14 + $0x18] sm:$0xff]  ;;  %352 = vst.msk [vmem:[#allocation2 + $0x28] sm:$0xff] %vm346_vm0, %v2139_v32  ;;  %s2052_s12 = sshll.u32 %s2142_s10, 4  ;;  %s2053_s12 = int_to_ptr.vmem [resolvable:$false] %s2052_s12 }
  0x57   : > { %1681 = vmatprep.subr.mxu0 %v423_v3  ;;  %v399_v20 = vld [vmem:[%s2325_s14 + $0x20] sm:$0xff]  ;;  %v400_v21 = vld [vmem:[%s2325_s14 + $0x28] sm:$0xff]  ;;  %v401_v22 = vld [vmem:[%s2325_s14 + $0x30] sm:$0xff]  ;;  %353 = vst.msk [vmem:[#allocation2 + $0x30] sm:$0xff] %vm346_vm0, %v2139_v32  ;;  %p2050_p0 = pnand %p2049_p8, %p2225_p9  ;;  %s2054_s30 = scalar_lea.vmem %s2053_s12, 4096 }
  0x58   : > { %1682 = vmatpush3.msra.mxu0 %v423_v3  ;;  %v402_v23 = vld [vmem:[%s2325_s14 + $0x38] sm:$0xff]  ;;  %v403_v24 = vld [vmem:[%s2325_s14 + $0x40] sm:$0xff]  ;;  %v404_v25 = vld [vmem:[%s2325_s14 + $0x48] sm:$0xff]  ;;  %354 = vst.msk [vmem:[#allocation2 + $0x38] sm:$0xff] %vm346_vm0, %v2139_v32  ;;  %p2055_p4 = scmp.lt.s32.totalorder %s2811_s1, %s2053_s12  ;;  %p2056_p10 = scmp.lt.s32.totalorder %s2054_s30, %s2048_s18 }
  0x59   : > { %1683 = vmatprep.subr.mxu0 %v422_v5  ;;  %v405_v26 = vld [vmem:[%s2325_s14 + $0x50] sm:$0xff]  ;;  %v406_v27 = vld [vmem:[%s2325_s14 + $0x58] sm:$0xff]  ;;  %v407_v28 = vld [vmem:[%s2325_s14 + $0x60] sm:$0xff]  ;;  %355 = vst.msk [vmem:[#allocation2 + $0x40] sm:$0xff] %vm346_vm0, %v2139_v32  ;;  %p2051_p3 = pneg %p2050_p0 }
  0x5a   : > { %1684 = vmatpush3.msra.mxu0 %v422_v5  ;;  %v408_v29 = vld [vmem:[%s2325_s14 + $0x68] sm:$0xff]  ;;  %v409_v30 = vld [vmem:[%s2325_s14 + $0x70] sm:$0xff]  ;;  %v410_v31 = vld [vmem:[%s2325_s14 + $0x78] sm:$0xff]  ;;  %356 = vst.msk [vmem:[#allocation2 + $0x48] sm:$0xff] %vm346_vm0, %v2139_v32  ;;  %p2057_p13 = por %p2056_p10, %p2055_p4 }
  0x5b   : > { %1685 = vmatprep.subr.mxu0 %v421_v6  ;;  %357 = vst.msk [vmem:[#allocation2 + $0x50] sm:$0xff] %vm346_vm0, %v2139_v32  ;;  %358 = vst.msk [vmem:[#allocation2 + $0x58] sm:$0xff] %vm346_vm0, %v2139_v32  ;;  %v2390_v34 = vld [vmem:[%s2863_s3] ss:$0 sm:$0xff]  ;;  %v1043_v4 = vld [vmem:[%s2473_s9 + $0x78] sm:$0xff] }
  0x5c   : > { %1686 = vmatpush3.msra.mxu0 %v421_v6  ;;  %359 = vst.msk [vmem:[#allocation2 + $0x60] sm:$0xff] %vm346_vm0, %v2139_v32  ;;  %360 = vst.msk [vmem:[#allocation2 + $0x68] sm:$0xff] %vm346_vm0, %v2139_v32  ;;  %v1042_v5 = vld [vmem:[%s2473_s9 + $0x70] sm:$0xff]  ;;  %1731 = vmatprep.subr.mxu1 %v1043_v4  ;;  %v1041_v6 = vld [vmem:[%s2473_s9 + $0x68] sm:$0xff]  ;;  %p2058_p12 = pnand %p2057_p13, %p2051_p3 }
  0x5d   : > { %1687 = vmatprep.subr.mxu0 %v420_v7  ;;  %361 = vst.msk [vmem:[#allocation2 + $0x70] sm:$0xff] %vm346_vm0, %v2139_v32  ;;  %362 = vst.msk [vmem:[#allocation2 + $0x78] sm:$0xff] %vm346_vm0, %v2139_v32  ;;  %1732 = vmatpush3.msra.mxu1 %v1043_v4  ;;  %v1033_v32 = vld [vmem:[%s2473_s9 + $0x28] sm:$0xff] }
  0x5e   : > { %1688 = vmatpush3.msra.mxu0 %v420_v7  ;;  %363 = vst.msk [vmem:[#allocation3] sm:$0xff] %vm346_vm0, %v2141_v0  ;;  %364 = vst.msk [vmem:[#allocation3 + $0x8] sm:$0xff] %vm346_vm0, %v2141_v0  ;;  %1733 = vmatprep.subr.mxu1 %v1042_v5  ;;  %v1040_v7 = vld [vmem:[%s2473_s9 + $0x60] sm:$0xff]  ;;  %v1029_v4 = vld [vmem:[%s2473_s9 + $0x8] sm:$0xff] }
  0x5f   : > { %1689 = vmatprep.subr.mxu0 %v419_v8  ;;  %365 = vst.msk [vmem:[#allocation3 + $0x10] sm:$0xff] %vm346_vm0, %v2141_v0  ;;  %366 = vst.msk [vmem:[#allocation3 + $0x18] sm:$0xff] %vm346_vm0, %v2141_v0  ;;  %1734 = vmatpush3.msra.mxu1 %v1042_v5 }
  0x60   : > { %1690 = vmatpush3.msra.mxu0 %v419_v8  ;;  %367 = vst.msk [vmem:[#allocation3 + $0x20] sm:$0xff] %vm346_vm0, %v2141_v0  ;;  %368 = vst.msk [vmem:[#allocation3 + $0x28] sm:$0xff] %vm346_vm0, %v2141_v0  ;;  %1735 = vmatprep.subr.mxu1 %v1041_v6  ;;  %v1039_v8 = vld [vmem:[%s2473_s9 + $0x58] sm:$0xff] }
  0x61   : > { %1691 = vmatprep.subr.mxu0 %v418_v9  ;;  %369 = vst.msk [vmem:[#allocation3 + $0x30] sm:$0xff] %vm346_vm0, %v2141_v0  ;;  %370 = vst.msk [vmem:[#allocation3 + $0x38] sm:$0xff] %vm346_vm0, %v2141_v0  ;;  %1736 = vmatpush3.msra.mxu1 %v1041_v6 }
  0x62   : > { %1692 = vmatpush3.msra.mxu0 %v418_v9  ;;  %371 = vst.msk [vmem:[#allocation3 + $0x40] sm:$0xff] %vm346_vm0, %v2141_v0  ;;  %372 = vst.msk [vmem:[#allocation3 + $0x48] sm:$0xff] %vm346_vm0, %v2141_v0  ;;  %1737 = vmatprep.subr.mxu1 %v1040_v7  ;;  %v2480_v9 = vld [vmem:[#allocation2] sm:$0xff] }
  0x63   : > { %1693 = vmatprep.subr.mxu0 %v417_v10  ;;  %373 = vst.msk [vmem:[#allocation3 + $0x50] sm:$0xff] %vm346_vm0, %v2141_v0  ;;  %374 = vst.msk [vmem:[#allocation3 + $0x58] sm:$0xff] %vm346_vm0, %v2141_v0  ;;  %1738 = vmatpush3.msra.mxu1 %v1040_v7 }
  0x64   : > { %1694 = vmatpush3.msra.mxu0 %v417_v10  ;;  %375 = vst.msk [vmem:[#allocation3 + $0x60] sm:$0xff] %vm346_vm0, %v2141_v0  ;;  %376 = vst.msk [vmem:[#allocation3 + $0x68] sm:$0xff] %vm346_vm0, %v2141_v0  ;;  %1739 = vmatprep.subr.mxu1 %v1039_v8  ;;  %v1038_v10 = vld [vmem:[%s2473_s9 + $0x50] sm:$0xff] }
  0x65   : > { %1695 = vmatprep.subr.mxu0 %v416_v11  ;;  %377 = vst.msk [vmem:[#allocation3 + $0x70] sm:$0xff] %vm346_vm0, %v2141_v0  ;;  %378 = vst.msk [vmem:[#allocation3 + $0x78] sm:$0xff] %vm346_vm0, %v2141_v0  ;;  %1740 = vmatpush3.msra.mxu1 %v1039_v8  ;;  %v2563_v0 = vld [vmem:[#allocation2 + $0x48] sm:$0xff]  ;;  %v2573_v8 = vld [vmem:[#allocation2 + $0x50] sm:$0xff] }
  0x66   : > { %1696 = vmatpush3.msra.mxu0 %v416_v11  ;;  %1741 = vmatprep.subr.mxu1 %v1038_v10 }
  0x67   : > { %1697 = vmatprep.subr.mxu0 %v415_v12  ;;  %1742 = vmatpush3.msra.mxu1 %v1038_v10  ;;  %v1028_v10 = vld [vmem:[%s2473_s9] sm:$0xff] }
  0x68   : > { %1698 = vmatpush3.msra.mxu0 %v415_v12  ;;  %v2483_v12 = vld [vmem:[#allocation2 + $0x18] sm:$0xff] }
  0x69   : > { %1699 = vmatprep.subr.mxu0 %v414_v13 }
  0x6a   : > { %1700 = vmatpush3.msra.mxu0 %v414_v13  ;;  %v1037_v13 = vld [vmem:[%s2473_s9 + $0x48] sm:$0xff] }
  0x6b   : > { %1701 = vmatprep.subr.mxu0 %v413_v14  ;;  %1743 = vmatprep.subr.mxu1 %v1037_v13 }
  0x6c   : > { %1702 = vmatpush3.msra.mxu0 %v413_v14  ;;  %1744 = vmatpush3.msra.mxu1 %v1037_v13 }
  0x6d   : > { %1703 = vmatprep.subr.mxu0 %v412_v15 }
  0x6e   : > { %1704 = vmatpush3.msra.mxu0 %v412_v15 }
  0x6f   : > { %1705 = vmatprep.subr.mxu0 %v411_v16 }
  0x70   : > { %1706 = vmatpush3.msra.mxu0 %v411_v16  ;;  %v2489_v16 = vld [vmem:[#allocation2 + $0x8] sm:$0xff] }
  0x71   : > { %1708 = vmatmul.mubr.f32.vlgmr.msra.gmra.mxu0 %v396_v17  ;;  %v1036_v17 = vld [vmem:[%s2473_s9 + $0x40] sm:$0xff] }
  0x72   : > { %1710 = vmatprep.mubr.f32.mxu0 %v397_v18  ;;  %1745 = vmatprep.subr.mxu1 %v1036_v17 }
  0x73   : > { %1746 = vmatpush3.msra.mxu1 %v1036_v17 }
  0x75   : > { %1711 = vmatmul.mubr.f32.gmra.mxu0 %v398_v19 }
  0x76   : > { %1713 = vmatprep.mubr.f32.mxu0 %v399_v20 }
  0x79   : > { %1714 = vmatmul.mubr.f32.gmra.mxu0 %v400_v21  ;;  %v2500_v21 = vld [vmem:[#allocation2 + $0x10] sm:$0xff] }
  0x7a   : > { %1716 = vmatprep.mubr.f32.mxu0 %v401_v22  ;;  %v1035_v22 = vld [vmem:[%s2473_s9 + $0x38] sm:$0xff] }
  0x7b   : > { %1747 = vmatprep.subr.mxu1 %v1035_v22 }
  0x7c   : > { %1748 = vmatpush3.msra.mxu1 %v1035_v22 }
  0x7d   : > { %1717 = vmatmul.mubr.f32.gmra.mxu0 %v402_v23 }
  0x7e   : > { %1719 = vmatprep.mubr.f32.mxu0 %v403_v24 }
  0x81   : > { %1720 = vmatmul.mubr.f32.gmra.mxu0 %v404_v25 }
  0x82   : > { %1722 = vmatprep.mubr.f32.mxu0 %v405_v26  ;;  %v2510_v26 = vld [vmem:[#allocation2 + $0x20] sm:$0xff] }
  0x85   : > { %1723 = vmatmul.mubr.f32.gmra.mxu0 %v406_v27  ;;  %v1034_v27 = vld [vmem:[%s2473_s9 + $0x30] sm:$0xff] }
  0x86   : > { %1725 = vmatprep.mubr.f32.mxu0 %v407_v28  ;;  %1749 = vmatprep.subr.mxu1 %v1034_v27 }
  0x87   : > { %1750 = vmatpush3.msra.mxu1 %v1034_v27  ;;  %v2594_v27 = vld [vmem:[#allocation2 + $0x60] sm:$0xff] }
  0x88   : > { %1751 = vmatprep.subr.mxu1 %v1033_v32 }
  0x89   : > { %1726 = vmatmul.mubr.f32.gmra.mxu0 %v408_v29  ;;  %1752 = vmatpush3.msra.mxu1 %v1033_v32 }
  0x8a   : > { %1728 = vmatprep.mubr.f32.mxu0 %v409_v30  ;;  %v2521_v30 = vld [vmem:[#allocation2 + $0x28] sm:$0xff] }
  0x8d   : > { %1729 = vmatmul.mubr.f32.gmra.mxu0 %v410_v31 }
 0x131   : > { %v1709_v33 = vpop.f32.mrf.mxu0 }
 0x132   : > { %v2400_v40 = vadd.f32 %v1709_v33, %v2390_v34 }
 0x133   : > { %v500_v35 = vpop.f32.mrf.mxu0 }
 0x134   : > { %v2393_v36 = vadd.f32 %v2390_v34, %v500_v35 }
 0x135   : > { %v1712_v37 = vpop.f32.mrf.mxu0 }
 0x136   : > { %v2396_v38 = vadd.f32 %v1712_v37, %v2390_v34  ;;  %595 = vmax.xlane.f32.xlu0 %v2393_v36  ;;  %v2531_v37 = vld [vmem:[#allocation2 + $0x30] sm:$0xff] }
 0x137   : > { %v510_v39 = vpop.f32.mrf.mxu0 }
 0x138   : > { %601 = vmax.xlane.f32.xlu1 %v2396_v38  ;;  %v2404_v41 = vadd.f32 %v2390_v34, %v510_v39  ;;  %v1032_v39 = vld [vmem:[%s2473_s9 + $0x20] sm:$0xff] }
 0x139   : > { %v1715_v42 = vpop.f32.mrf.mxu0  ;;  %1753 = vmatprep.subr.mxu1 %v1032_v39 }
 0x13a   : > { %597 = vmax.xlane.f32.xlu0 %v2400_v40  ;;  %v2409_v44 = vadd.f32 %v1715_v42, %v2390_v34  ;;  %1754 = vmatpush3.msra.mxu1 %v1032_v39 }
 0x13b   : > { %v520_v43 = vpop.f32.mrf.mxu0 }
 0x13c   : > { %599 = vmax.xlane.f32.xlu1 %v2404_v41  ;;  %v2412_v45 = vadd.f32 %v2390_v34, %v520_v43 }
 0x13d   : > { %v1718_v46 = vpop.f32.mrf.mxu0 }
 0x13e   : > { %603 = vmax.xlane.f32.xlu0 %v2412_v45  ;;  %v2417_v48 = vadd.f32 %v1718_v46, %v2390_v34  ;;  %v2542_v46 = vld [vmem:[#allocation2 + $0x38] sm:$0xff] }
 0x13f   : > { %v530_v47 = vpop.f32.mrf.mxu0 }
 0x140   : > { %605 = vmax.xlane.f32.xlu1 %v2409_v44  ;;  %v2420_v49 = vadd.f32 %v2390_v34, %v530_v47 }
 0x141   : > { %v1721_v50 = vpop.f32.mrf.mxu0 }
 0x142   : > { %607 = vmax.xlane.f32.xlu0 %v2420_v49  ;;  %v2425_v53 = vadd.f32 %v1721_v50, %v2390_v34  ;;  %v1031_v50 = vld [vmem:[%s2473_s9 + $0x18] sm:$0xff] }
 0x143   : > { %v540_v52 = vpop.f32.mrf.mxu0  ;;  %1755 = vmatprep.subr.mxu1 %v1031_v50 }
 0x144   : > { %609 = vmax.xlane.f32.xlu1 %v2417_v48  ;;  %v2428_v54 = vadd.f32 %v2390_v34, %v540_v52  ;;  %1756 = vmatpush3.msra.mxu1 %v1031_v50 }
 0x145   : > { %v1724_v55 = vpop.f32.mrf.mxu0 }
 0x146   : > { %611 = vmax.xlane.f32.xlu0 %v2428_v54  ;;  %v2433_v57 = vadd.f32 %v1724_v55, %v2390_v34 }
 0x147   : > { %v550_v56 = vpop.f32.mrf.mxu0 }
 0x148   : > { %613 = vmax.xlane.f32.xlu1 %v2425_v53  ;;  %v2436_v58 = vadd.f32 %v2390_v34, %v550_v56  ;;  %v2552_v56 = vld [vmem:[#allocation2 + $0x40] sm:$0xff] }
 0x149   : > { %v1727_v59 = vpop.f32.mrf.mxu0 }
 0x14a   : > { %615 = vmax.xlane.f32.xlu0 %v2436_v58  ;;  %v2441_v61 = vadd.f32 %v1727_v59, %v2390_v34  ;;  %v1030_v59 = vld [vmem:[%s2473_s9 + $0x10] sm:$0xff] }
 0x14b   : > { %v560_v60 = vpop.f32.mrf.mxu0  ;;  %1757 = vmatprep.subr.mxu1 %v1030_v59 }
 0x14c   : > { %617 = vmax.xlane.f32.xlu1 %v2433_v57  ;;  %v2444_v62 = vadd.f32 %v2390_v34, %v560_v60  ;;  %1758 = vmatpush3.msra.mxu1 %v1030_v59  ;;  %v2614_v59 = vld [vmem:[#allocation2 + $0x70] sm:$0xff] }
 0x14d   : > { %v1730_v63 = vpop.f32.mrf.mxu0  ;;  %1759 = vmatprep.subr.mxu1 %v1029_v4 }
 0x14e   : > { %619 = vmax.xlane.f32.xlu0 %v2444_v62  ;;  %v2465_v2 = vadd.f32 %v1730_v63, %v2390_v34  ;;  %1760 = vmatpush3.msra.mxu1 %v1029_v4 }
 0x14f   : > { %v570_v1 = vpop.f32.mrf.mxu0  ;;  %1761 = vmatprep.subr.mxu1 %v1028_v10 }
 0x150   : > { %621 = vmax.xlane.f32.xlu1 %v2441_v61  ;;  %v2468_v3 = vadd.f32 %v2390_v34, %v570_v1  ;;  %1762 = vmatpush3.msra.mxu1 %v1028_v10 }
 0x152   : > { %623 = vmax.xlane.f32.xlu0 %v2468_v3 }
 0x154   : > { %625 = vmax.xlane.f32.xlu1 %v2465_v2 }
 0x1bf   : > { %v596_v11 = vpop.xlane.xlu0 %595 }
 0x1c0   : > { %v2487_v14 = vmax.f32 %v2480_v9, %v596_v11 }
 0x1c1   : > { %v602_v15 = vpop.xlane.xlu1 %601 }
 0x1c2   : > { %v643_v18 = vsub.f32 %v2480_v9, %v2487_v14  ;;  %1221 = vst.msk [vmem:[#allocation2] sm:$0xff] %vm346_vm0, %v2487_v14  ;;  %v2497_v19 = vmax.f32 %v2483_v12, %v602_v15  ;;  %693 = vperm.xlu0 %1866, %v2487_v14   ;;  %v2584_v15 = vld [vmem:[#allocation2 + $0x58] sm:$0xff] }
 0x1c3   : > { %v598_v20 = vpop.xlane.xlu0 %597 }
 0x1c4   : > { %1224 = vst.msk [vmem:[#allocation2 + $0x18] sm:$0xff] %vm346_vm0, %v2497_v19  ;;  %v2508_v24 = vmax.f32 %v2489_v16, %v598_v20 }
 0x1c5   : > { %v600_v25 = vpop.xlane.xlu1 %599 }
 0x1c6   : > { %v644_v28 = vsub.f32 %v2489_v16, %v2508_v24  ;;  %1222 = vst.msk [vmem:[#allocation2 + $0x8] sm:$0xff] %vm346_vm0, %v2508_v24  ;;  %v2518_v29 = vmax.f32 %v2500_v21, %v600_v25  ;;  %698 = vperm.xlu1 %1867, %v2508_v24  }
 0x1c7   : > { %v604_v31 = vpop.xlane.xlu0 %603 }
 0x1c8   : > { %v645_v33 = vsub.f32 %v2500_v21, %v2518_v29  ;;  %1223 = vst.msk [vmem:[#allocation2 + $0x10] sm:$0xff] %vm346_vm0, %v2518_v29  ;;  %v2529_v34 = vmax.f32 %v2510_v26, %v604_v31 }
 0x1c9   : > { %v606_v35 = vpop.xlane.xlu1 %605 }
 0x1ca   : > { %v2535_v42 = vmax.f32 %v2521_v30, %v606_v35  ;;  %708 = vperm.xlu1 %1867, %v2497_v19   ;;  %1225 = vst.msk [vmem:[#allocation2 + $0x20] sm:$0xff] %vm346_vm0, %v2529_v34  ;;  %v2604_v35 = vld [vmem:[#allocation2 + $0x68] sm:$0xff]  ;;  %v2885_v16 = vsub.f32 %v2510_v26, %v2529_v34 }
 0x1cb   : > { %v608_v47 = vpop.xlane.xlu0 %607 }
 0x1cc   : > { %1226 = vst.msk [vmem:[#allocation2 + $0x28] sm:$0xff] %vm346_vm0, %v2535_v42  ;;  %v2550_v52 = vmax.f32 %v2531_v37, %v608_v47  ;;  %v667_v24 = vmul.f32 1.442695, %v2885_v16  ;;  %v2888_v9 = vsub.f32 %v2521_v30, %v2535_v42 }
 0x1cd   : > { %v610_v55 = vpop.xlane.xlu1 %609 }
 0x1ce   : > { %v2556_v60 = vmax.f32 %v2542_v46, %v610_v55  ;;  %703 = vperm.xlu1 %1867, %v2518_v29   ;;  %1227 = vst.msk [vmem:[#allocation2 + $0x30] sm:$0xff] %vm346_vm0, %v2550_v52  ;;  %v2887_v21 = vsub.f32 %v2531_v37, %v2550_v52  ;;  %v669_v14 = vmul.f32 1.442695, %v2888_v9 }
 0x1cf   : > { %v612_v1 = vpop.xlane.xlu0 %611 }
 0x1d0   : > { %1228 = vst.msk [vmem:[#allocation2 + $0x38] sm:$0xff] %vm346_vm0, %v2556_v60  ;;  %v2571_v6 = vmax.f32 %v2552_v56, %v612_v1  ;;  %v671_v29 = vmul.f32 1.442695, %v2887_v21  ;;  %v826_v21 = vld [vmem:[#allocation3 + $0x38] sm:$0xff] }
 0x1d1   : > { %v614_v7 = vpop.xlane.xlu1 %613 }
 0x1d2   : > { %v2577_v11 = vmax.f32 %v2563_v0, %v614_v7  ;;  %718 = vperm.xlu1 %1867, %v2535_v42   ;;  %1229 = vst.msk [vmem:[#allocation2 + $0x40] sm:$0xff] %vm346_vm0, %v2571_v6  ;;  %v2624_v7 = vld [vmem:[#allocation2 + $0x78] sm:$0xff] }
 0x1d3   : > { %v616_v17 = vpop.xlane.xlu0 %615 }
 0x1d4   : > { %1230 = vst.msk [vmem:[#allocation2 + $0x48] sm:$0xff] %vm346_vm0, %v2577_v11  ;;  %738 = vperm.xlu0 %1866, %v2577_v11   ;;  %v2592_v22 = vmax.f32 %v2573_v8, %v616_v17  ;;  %v2892_v30 = vsub.f32 %v2563_v0, %v2577_v11 }
 0x1d5   : > { %v618_v25 = vpop.xlane.xlu1 %617 }
 0x1d6   : > { %v2597_v31 = vmax.f32 %v2584_v15, %v618_v25  ;;  %713 = vperm.xlu1 %1867, %v2529_v34   ;;  %1231 = vst.msk [vmem:[#allocation2 + $0x50] sm:$0xff] %vm346_vm0, %v2592_v22  ;;  %v2891_v34 = vsub.f32 %v2573_v8, %v2592_v22  ;;  %v677_v42 = vmul.f32 1.442695, %v2892_v30 }
 0x1d7   : > { %v620_v39 = vpop.xlane.xlu0 %619 }
 0x1d8   : > { %1232 = vst.msk [vmem:[#allocation2 + $0x58] sm:$0xff] %vm346_vm0, %v2597_v31  ;;  %748 = vperm.xlu0 %1866, %v2597_v31   ;;  %v2612_v50 = vmax.f32 %v2594_v27, %v620_v39  ;;  %v679_v37 = vmul.f32 1.442695, %v2891_v34  ;;  %v828_v34 = vld [vmem:[#allocation3 + $0x48] sm:$0xff] }
 0x1d9   : > { %v622_v55 = vpop.xlane.xlu1 %621 }
 0x1da   : > { %v2617_v1 = vmax.f32 %v2604_v35, %v622_v55  ;;  %728 = vperm.xlu1 %1867, %v2556_v60   ;;  %1233 = vst.msk [vmem:[#allocation2 + $0x60] sm:$0xff] %vm346_vm0, %v2612_v50 }
 0x1db   : > { %v624_v10 = vpop.xlane.xlu0 %623 }
 0x1dc   : > { %1234 = vst.msk [vmem:[#allocation2 + $0x68] sm:$0xff] %vm346_vm0, %v2617_v1  ;;  %758 = vperm.xlu0 %1866, %v2617_v1   ;;  %v2632_v25 = vmax.f32 %v2614_v59, %v624_v10 }
 0x1dd   : > { %v626_v39 = vpop.xlane.xlu1 %625 }
 0x1de   : > { %v2635_v55 = vmax.f32 %v2624_v7, %v626_v39  ;;  %723 = vperm.xlu1 %1867, %v2550_v52   ;;  %1235 = vst.msk [vmem:[#allocation2 + $0x70] sm:$0xff] %vm346_vm0, %v2632_v25  ;;  %v2895_v0 = vsub.f32 %v2614_v59, %v2632_v25 }
 0x1e0   : > { %1236 = vst.msk [vmem:[#allocation2 + $0x78] sm:$0xff] %vm346_vm0, %v2635_v55  ;;  %768 = vperm.xlu0 %1866, %v2635_v55   ;;  %v687_v11 = vmul.f32 1.442695, %v2895_v0  ;;  %v2897_v59 = vsub.f32 %v2624_v7, %v2635_v55 }
 0x1e2   : > { %733 = vperm.xlu1 %1867, %v2571_v6  }
 0x1e6   : > { %743 = vperm.xlu1 %1867, %v2592_v22  }
 0x1ea   : > { %753 = vperm.xlu1 %1867, %v2612_v50  }
 0x1ee   : > { %763 = vperm.xlu1 %1867, %v2632_v25   ;;  %v689_v25 = vmul.f32 1.442695, %v2897_v59 }
 0x23d   : > { %v694_v10 = vpop.permute.xlu0 %693 }
 0x23e   : > { %v771_v39 = vsub.f32 %v2393_v36, %v694_v10 }
 0x240   : > { %v787_v47 = vmul.f32 1.442695, %v771_v39 }
 0x241   : > { %v699_v4 = vpop.permute.xlu1 %698 }
 0x242   : > { %1868 = vpow2.f32 %v787_v47  ;;  %v772_v17 = vsub.f32 %v2400_v40, %v699_v4 }
 0x244   : > { %v789_v20 = vmul.f32 1.442695, %v772_v17 }
 0x245   : > { %v709_v32 = vpop.permute.xlu1 %708 }
 0x246   : > { %1870 = vpow2.f32 %v789_v20  ;;  %v774_v5 = vsub.f32 %v2396_v38, %v709_v32 }
 0x248   : > { %v793_v13 = vmul.f32 1.442695, %v774_v5 }
 0x249   : > { %v704_v51 = vpop.permute.xlu1 %703 }
 0x24a   : > { %1872 = vpow2.f32 %v793_v13  ;;  %v773_v63 = vsub.f32 %v2404_v41, %v704_v51 }
 0x24c   : > { %v791_v23 = vmul.f32 1.442695, %v773_v63 }
 0x24d   : > { %v719_v43 = vpop.permute.xlu1 %718 }
 0x24e   : > { %1874 = vpow2.f32 %v791_v23  ;;  %v776_v36 = vsub.f32 %v2409_v44, %v719_v43 }
 0x24f   : > { %v1869_v10 = vpop.eup %1868  ;;  %v739_v39 = vpop.permute.xlu0 %738 }
 0x250   : > { %v797_v47 = vmul.f32 1.442695, %v776_v36  ;;  %851 = vadd.xlane.f32.xlu1 %v1869_v10  ;;  %1763 = vmatprep.mubr.f32.mxu1 %v1869_v10  ;;  %v780_v44 = vsub.f32 %v2425_v53, %v739_v39 }
 0x251   : > { %v714_v40 = vpop.permute.xlu1 %713 }
 0x252   : > { %1876 = vpow2.f32 %v797_v47  ;;  %v775_v20 = vsub.f32 %v2412_v45, %v714_v40  ;;  %v805_v17 = vmul.f32 1.442695, %v780_v44 }
 0x253   : > { %v1871_v38 = vpop.eup %1870  ;;  %v749_v32 = vpop.permute.xlu0 %748 }
 0x254   : > { %v795_v5 = vmul.f32 1.442695, %v775_v20  ;;  %853 = vadd.xlane.f32.xlu0 %v1871_v38  ;;  %1764 = vmatmul.mubr.f32.vlgmr.msra.gmra.mxu1 %v1871_v38  ;;  %v782_v36 = vsub.f32 %v2433_v57, %v749_v32 }
 0x255   : > { %v729_v41 = vpop.permute.xlu1 %728 }
 0x256   : > { %1878 = vpow2.f32 %v795_v5  ;;  %v778_v23 = vsub.f32 %v2417_v48, %v729_v41  ;;  %v809_v39 = vmul.f32 1.442695, %v782_v36 }
 0x257   : > { %v1873_v51 = vpop.eup %1872  ;;  %v759_v13 = vpop.permute.xlu0 %758 }
 0x258   : > { %v801_v43 = vmul.f32 1.442695, %v778_v23  ;;  %857 = vadd.xlane.f32.xlu1 %v1873_v51  ;;  %v784_v40 = vsub.f32 %v2441_v61, %v759_v13 }
 0x259   : > { %v724_v63 = vpop.permute.xlu1 %723 }
 0x25a   : > { %1880 = vpow2.f32 %v801_v43  ;;  %v777_v4 = vsub.f32 %v2420_v49, %v724_v63  ;;  %v813_v32 = vmul.f32 1.442695, %v784_v40 }
 0x25b   : > { %v1875_v45 = vpop.eup %1874  ;;  %v769_v20 = vpop.permute.xlu0 %768 }
 0x25c   : > { %v799_v10 = vmul.f32 1.442695, %v777_v4  ;;  %855 = vadd.xlane.f32.xlu0 %v1875_v45  ;;  %1766 = vmatprep.mubr.f32.mxu1 %v1875_v45  ;;  %v786_v41 = vsub.f32 %v2465_v2, %v769_v20 }
 0x25d   : > { %v734_v47 = vpop.permute.xlu1 %733  ;;  %1767 = vmatmul.mubr.f32.gmra.mxu1 %v1873_v51 }
 0x25e   : > { %1882 = vpow2.f32 %v799_v10  ;;  %v779_v48 = vsub.f32 %v2428_v54, %v734_v47  ;;  %v817_v44 = vmul.f32 1.442695, %v786_v41  ;;  %v661_v47 = vmul.f32 1.442695, %v644_v28  ;;  %v819_v41 = vld [vmem:[#allocation3] sm:$0xff] }
 0x25f   : > { %v1877_v53 = vpop.eup %1876  ;;  %1884 = vpow2.f32 %v805_v17  ;;  %v2886_v28 = vsub.f32 %v2483_v12, %v2497_v19  ;;  %v2890_v12 = vsub.f32 %v2542_v46, %v2556_v60  ;;  %v2894_v60 = vsub.f32 %v2584_v15, %v2597_v31 }
 0x260   : > { %v803_v38 = vmul.f32 1.442695, %v779_v48  ;;  %861 = vadd.xlane.f32.xlu1 %v1877_v53 }
 0x261   : > { %v744_v49 = vpop.permute.xlu1 %743  ;;  %v665_v40 = vmul.f32 1.442695, %v2886_v28  ;;  %v673_v19 = vmul.f32 1.442695, %v2890_v12  ;;  %v681_v8 = vmul.f32 1.442695, %v2894_v60 }
 0x262   : > { %1886 = vpow2.f32 %v803_v38  ;;  %v781_v57 = vsub.f32 %v2436_v58, %v744_v49 }
 0x263   : > { %v1879_v5 = vpop.eup %1878  ;;  %1888 = vpow2.f32 %v809_v39  ;;  %v659_v39 = vmul.f32 1.442695, %v643_v18  ;;  %v2889_v18 = vsub.f32 %v2552_v56, %v2571_v6  ;;  %v2893_v6 = vsub.f32 %v2594_v27, %v2612_v50 }
 0x264   : > { %v807_v23 = vmul.f32 1.442695, %v781_v57  ;;  %859 = vadd.xlane.f32.xlu0 %v1879_v5  ;;  %1769 = vmatprep.mubr.f32.mxu1 %v1879_v5  ;;  %v2896_v50 = vsub.f32 %v2604_v35, %v2617_v1 }
 0x265   : > { %v754_v54 = vpop.permute.xlu1 %753  ;;  %1770 = vmatmul.mubr.f32.gmra.mxu1 %v1877_v53  ;;  %v663_v53 = vmul.f32 1.442695, %v645_v33  ;;  %v675_v26 = vmul.f32 1.442695, %v2889_v18  ;;  %v683_v20 = vmul.f32 1.442695, %v2893_v6 }
 0x266   : > { %1890 = vpow2.f32 %v807_v23  ;;  %v783_v61 = vsub.f32 %v2444_v62, %v754_v54  ;;  %v685_v49 = vmul.f32 1.442695, %v2896_v50  ;;  %v827_v6 = vld [vmem:[#allocation3 + $0x40] sm:$0xff] }
 0x267   : > { %v1881_v51 = vpop.eup %1880  ;;  %1892 = vpow2.f32 %v813_v32 }
 0x268   : > { %v811_v43 = vmul.f32 1.442695, %v783_v61  ;;  %865 = vadd.xlane.f32.xlu1 %v1881_v51  ;;  %v820_v61 = vld [vmem:[#allocation3 + $0x8] sm:$0xff] }
 0x269   : > { %v764_v63 = vpop.permute.xlu1 %763 }
 0x26a   : > { %1894 = vpow2.f32 %v811_v43  ;;  %v785_v58 = vsub.f32 %v2468_v3, %v764_v63  ;;  %v822_v63 = vld [vmem:[#allocation3 + $0x18] sm:$0xff] }
 0x26b   : > { %v1883_v13 = vpop.eup %1882  ;;  %1896 = vpow2.f32 %v817_v44 }
 0x26c   : > { %v1885_v2 = vpop.eup %1884  ;;  %v815_v4 = vmul.f32 1.442695, %v785_v58  ;;  %863 = vadd.xlane.f32.xlu0 %v1883_v13  ;;  %1772 = vmatprep.mubr.f32.mxu1 %v1883_v13 }
 0x26d   : > { %869 = vadd.xlane.f32.xlu1 %v1885_v2  ;;  %1773 = vmatmul.mubr.f32.gmra.mxu1 %v1881_v51 }
 0x26e   : > { %1898 = vpow2.f32 %v815_v4  ;;  %v821_v4 = vld [vmem:[#allocation3 + $0x10] sm:$0xff] }
 0x26f   : > { %v1887_v45 = vpop.eup %1886  ;;  %1900 = vpow2.f32 %v661_v47 }
 0x270   : > { %v1889_v62 = vpop.eup %1888  ;;  %867 = vadd.xlane.f32.xlu0 %v1887_v45  ;;  %1775 = vmatprep.mubr.f32.mxu1 %v1887_v45  ;;  %1902 = vpow2.f32 %v663_v53 }
 0x271   : > { %873 = vadd.xlane.f32.xlu1 %v1889_v62  ;;  %1776 = vmatmul.mubr.f32.gmra.mxu1 %v1885_v2  ;;  %1904 = vpow2.f32 %v659_v39  ;;  %v823_v39 = vld [vmem:[#allocation3 + $0x20] sm:$0xff] }
 0x272   : > { %1906 = vpow2.f32 %v667_v24 }
 0x273   : > { %v1891_v17 = vpop.eup %1890  ;;  %1908 = vpow2.f32 %v665_v40 }
 0x274   : > { %v1893_v36 = vpop.eup %1892  ;;  %871 = vadd.xlane.f32.xlu0 %v1891_v17  ;;  %1778 = vmatprep.mubr.f32.mxu1 %v1891_v17  ;;  %1910 = vpow2.f32 %v671_v29 }
 0x275   : > { %877 = vadd.xlane.f32.xlu1 %v1893_v36  ;;  %1779 = vmatmul.mubr.f32.gmra.mxu1 %v1889_v62  ;;  %1912 = vpow2.f32 %v669_v14 }
 0x276   : > { %1914 = vpow2.f32 %v675_v26 }
 0x277   : > { %v1895_v3 = vpop.eup %1894  ;;  %1916 = vpow2.f32 %v673_v19 }
 0x278   : > { %v1897_v10 = vpop.eup %1896  ;;  %875 = vadd.xlane.f32.xlu0 %v1895_v3  ;;  %1781 = vmatprep.mubr.f32.mxu1 %v1895_v3  ;;  %1918 = vpow2.f32 %v679_v37  ;;  %v824_v3 = vld [vmem:[#allocation3 + $0x28] sm:$0xff] }
 0x279   : > { %881 = vadd.xlane.f32.xlu1 %v1897_v10  ;;  %1782 = vmatmul.mubr.f32.gmra.mxu1 %v1893_v36  ;;  %1920 = vpow2.f32 %v677_v42 }
 0x27a   : > { %1922 = vpow2.f32 %v683_v20 }
 0x27b   : > { %v1899_v48 = vpop.eup %1898  ;;  %1924 = vpow2.f32 %v681_v8  ;;  %v830_v8 = vld [vmem:[#allocation3 + $0x58] sm:$0xff] }
 0x27c   : > { %879 = vadd.xlane.f32.xlu0 %v1899_v48  ;;  %1784 = vmatprep.mubr.f32.mxu1 %v1899_v48  ;;  %v1901_v33 = vpop.eup %1900  ;;  %1926 = vpow2.f32 %v687_v11 }
 0x27d   : > { %1785 = vmatmul.mubr.f32.gmra.mxu1 %v1897_v10  ;;  %v1903_v52 = vpop.eup %1902  ;;  %1928 = vpow2.f32 %v685_v49  ;;  %v836_v44 = vmul.f32 %v1901_v33, %v820_v61  ;;  %v829_v49 = vld [vmem:[#allocation3 + $0x50] sm:$0xff] }
 0x27e   : > { %v1905_v56 = vpop.eup %1904  ;;  %1930 = vpow2.f32 %v689_v25  ;;  %v837_v17 = vmul.f32 %v1903_v52, %v821_v4 }
 0x27f   : > { %v2703_v46 = vpop.eup %1906  ;;  %v835_v23 = vmul.f32 %v1905_v56, %v819_v41 }
 0x280   : > { %v1909_v22 = vpop.eup %1908  ;;  %v839_v28 = vmul.f32 %v2703_v46, %v823_v39 }
 0x281   : > { %v2712_v38 = vpop.eup %1910  ;;  %v838_v13 = vmul.f32 %v1909_v22, %v822_v63 }
 0x282   : > { %v1913_v27 = vpop.eup %1912 }
 0x283   : > { %v2718_v15 = vpop.eup %1914  ;;  %v840_v48 = vmul.f32 %v1913_v27, %v824_v3 }
 0x284   : > { %v1917_v31 = vpop.eup %1916  ;;  %v843_v11 = vmul.f32 %v2718_v15, %v827_v6 }
 0x285   : > { %v2724_v57 = vpop.eup %1918  ;;  %v842_v14 = vmul.f32 %v1917_v31, %v826_v21 }
 0x286   : > { %v2727_v5 = vpop.eup %1920 }
 0x287   : > { %v2729_v35 = vpop.eup %1922  ;;  %v844_v42 = vmul.f32 %v2727_v5, %v828_v34 }
 0x288   : > { %v2733_v1 = vpop.eup %1924 }
 0x289   : > { %v2735_v32 = vpop.eup %1926 }
 0x28a   : > { %939 = vperm.xlu1 %1867, %v1901_v33   ;;  %v2739_v7 = vpop.eup %1928  ;;  %v825_v33 = vld [vmem:[#allocation3 + $0x30] sm:$0xff] }
 0x28b   : > { %v2742_v55 = vpop.eup %1930 }
 0x28e   : > { %944 = vperm.xlu1 %1867, %v1903_v52   ;;  %v841_v52 = vmul.f32 %v2712_v38, %v825_v33 }
 0x292   : > { %954 = vperm.xlu1 %1867, %v2703_v46   ;;  %934 = vperm.xlu0 %1866, %v1905_v56  }
 0x296   : > { %964 = vperm.xlu1 %1867, %v2712_v38   ;;  %949 = vperm.xlu0 %1866, %v1909_v22   ;;  %v846_v38 = vmul.f32 %v2733_v1, %v830_v8 }
 0x29a   : > { %974 = vperm.xlu1 %1867, %v2718_v15   ;;  %959 = vperm.xlu0 %1866, %v1913_v27  }
 0x29e   : > { %984 = vperm.xlu1 %1867, %v2724_v57   ;;  %969 = vperm.xlu0 %1866, %v1917_v31  }
 0x2a2   : > { %994 = vperm.xlu1 %1867, %v2729_v35   ;;  %979 = vperm.xlu0 %1866, %v2727_v5   ;;  %v832_v5 = vld [vmem:[#allocation3 + $0x68] sm:$0xff] }
 0x2a3   : > { %v848_v61 = vmul.f32 %v2739_v7, %v832_v5 }
 0x2a6   : > { %1004 = vperm.xlu1 %1867, %v2735_v32   ;;  %989 = vperm.xlu0 %1866, %v2733_v1  }
 0x2aa   : > { %999 = vperm.xlu0 %1866, %v2739_v7  }
 0x2ae   : > { %1009 = vperm.xlu0 %1866, %v2742_v55  }
 0x2d9   : > { %v852_v54 = vpop.xlane.xlu1 %851 }
 0x2da   : > { %v883_v51 = vadd.f32 %v852_v54, %v835_v23  ;;  %v845_v54 = vmul.f32 %v2724_v57, %v829_v49 }
 0x2dc   : > { %900 = vst.msk [vmem:[#allocation3] sm:$0xff] %vm346_vm0, %v883_v51  ;;  %v831_v51 = vld [vmem:[#allocation3 + $0x60] sm:$0xff] }
 0x2dd   : > { %v854_v43 = vpop.xlane.xlu0 %853  ;;  %v847_v4 = vmul.f32 %v2729_v35, %v831_v51 }
 0x2de   : > { %v884_v58 = vadd.f32 %v854_v43, %v836_v44 }
 0x2e0   : > { %901 = vst.msk [vmem:[#allocation3 + $0x8] sm:$0xff] %vm346_vm0, %v884_v58  ;;  %v834_v58 = vld [vmem:[#allocation3 + $0x78] sm:$0xff] }
 0x2e1   : > { %v858_v2 = vpop.xlane.xlu1 %857  ;;  %v850_v7 = vmul.f32 %v2742_v55, %v834_v58 }
 0x2e2   : > { %v886_v45 = vadd.f32 %v858_v2, %v838_v13 }
 0x2e3   : > { %v1240_v62 = vld [vmem:[#allocation3] sm:$0xff] }
 0x2e4   : > { %903 = vst.msk [vmem:[#allocation3 + $0x18] sm:$0xff] %vm346_vm0, %v886_v45  ;;  %1932 = vrcp.f32 %v1240_v62 }
 0x2e5   : > { %v856_v36 = vpop.xlane.xlu0 %855 }
 0x2e6   : > { %v885_v10 = vadd.f32 %v856_v36, %v837_v17  ;;  %v833_v17 = vld [vmem:[#allocation3 + $0x70] sm:$0xff] }
 0x2e7   : > { %v1241_v47 = vld [vmem:[#allocation3 + $0x8] sm:$0xff]  ;;  %v849_v35 = vmul.f32 %v2735_v32, %v833_v17 }
 0x2e8   : > { %902 = vst.msk [vmem:[#allocation3 + $0x10] sm:$0xff] %vm346_vm0, %v885_v10  ;;  %1934 = vrcp.f32 %v1241_v47 }
 0x2e9   : > { %v862_v53 = vpop.xlane.xlu1 %861 }
 0x2ea   : > { %v888_v16 = vadd.f32 %v862_v53, %v840_v48 }
 0x2eb   : > { %v1243_v24 = vld [vmem:[#allocation3 + $0x18] sm:$0xff] }
 0x2ec   : > { %905 = vst.msk [vmem:[#allocation3 + $0x28] sm:$0xff] %vm346_vm0, %v888_v16  ;;  %1936 = vrcp.f32 %v1243_v24 }
 0x2ed   : > { %v860_v40 = vpop.xlane.xlu0 %859 }
 0x2ee   : > { %v887_v29 = vadd.f32 %v860_v40, %v839_v28 }
 0x2ef   : > { %v1242_v9 = vld [vmem:[#allocation3 + $0x10] sm:$0xff] }
 0x2f0   : > { %904 = vst.msk [vmem:[#allocation3 + $0x20] sm:$0xff] %vm346_vm0, %v887_v29  ;;  %1938 = vrcp.f32 %v1242_v9 }
 0x2f1   : > { %v1933_v18 = vpop.eup %1932  ;;  %v866_v26 = vpop.xlane.xlu1 %865 }
 0x2f2   : > { %v890_v12 = vadd.f32 %v866_v26, %v842_v14  ;;  %v1272_v19 = vmul.f32 0.17677669, %v1933_v18 }
 0x2f3   : > { %v1245_v37 = vld [vmem:[#allocation3 + $0x28] sm:$0xff] }
 0x2f4   : > { %907 = vst.msk [vmem:[#allocation3 + $0x38] sm:$0xff] %vm346_vm0, %v890_v12  ;;  %1306 = vperm.xlu1 %1867, %v1272_v19   ;;  %1940 = vrcp.f32 %v1245_v37 }
 0x2f5   : > { %v1935_v30 = vpop.eup %1934  ;;  %v864_v56 = vpop.xlane.xlu0 %863 }
 0x2f6   : > { %v870_v20 = vpop.xlane.xlu1 %869  ;;  %v889_v46 = vadd.f32 %v864_v56, %v841_v52  ;;  %v1273_v60 = vmul.f32 0.17677669, %v1935_v30 }
 0x2f7   : > { %v892_v22 = vadd.f32 %v870_v20, %v844_v42  ;;  %v1244_v0 = vld [vmem:[#allocation3 + $0x20] sm:$0xff] }
 0x2f8   : > { %906 = vst.msk [vmem:[#allocation3 + $0x30] sm:$0xff] %vm346_vm0, %v889_v46  ;;  %1311 = vperm.xlu0 %1866, %v1273_v60   ;;  %1942 = vrcp.f32 %v1244_v0 }
 0x2f9   : > { %v1937_v27 = vpop.eup %1936  ;;  %909 = vst.msk [vmem:[#allocation3 + $0x48] sm:$0xff] %vm346_vm0, %v892_v22  ;;  %v868_v50 = vpop.xlane.xlu0 %867 }
 0x2fa   : > { %v874_v31 = vpop.xlane.xlu1 %873  ;;  %v891_v59 = vadd.f32 %v868_v50, %v843_v11  ;;  %v1275_v25 = vmul.f32 0.17677669, %v1937_v27 }
 0x2fb   : > { %v894_v41 = vadd.f32 %v874_v31, %v846_v38  ;;  %v1247_v23 = vld [vmem:[#allocation3 + $0x38] sm:$0xff] }
 0x2fc   : > { %908 = vst.msk [vmem:[#allocation3 + $0x40] sm:$0xff] %vm346_vm0, %v891_v59  ;;  %1321 = vperm.xlu0 %1866, %v1275_v25   ;;  %1944 = vrcp.f32 %v1247_v23 }
 0x2fd   : > { %v1939_v15 = vpop.eup %1938  ;;  %911 = vst.msk [vmem:[#allocation3 + $0x58] sm:$0xff] %vm346_vm0, %v894_v41  ;;  %v872_v1 = vpop.xlane.xlu0 %871 }
 0x2fe   : > { %v878_v44 = vpop.xlane.xlu1 %877  ;;  %v893_v43 = vadd.f32 %v872_v1, %v845_v54  ;;  %v1274_v63 = vmul.f32 0.17677669, %v1939_v15 }
 0x2ff   : > { %v896_v13 = vadd.f32 %v878_v44, %v848_v61  ;;  %v1246_v2 = vld [vmem:[#allocation3 + $0x30] sm:$0xff] }
 0x300   : > { %910 = vst.msk [vmem:[#allocation3 + $0x50] sm:$0xff] %vm346_vm0, %v893_v43  ;;  %1316 = vperm.xlu1 %1867, %v1274_v63   ;;  %v1249_v57 = vld [vmem:[#allocation3 + $0x48] sm:$0xff]  ;;  %1946 = vrcp.f32 %v1246_v2 }
 0x301   : > { %v1941_v45 = vpop.eup %1940  ;;  %913 = vst.msk [vmem:[#allocation3 + $0x68] sm:$0xff] %vm346_vm0, %v896_v13  ;;  %v876_v62 = vpop.xlane.xlu0 %875  ;;  %1948 = vrcp.f32 %v1249_v57 }
 0x302   : > { %v882_v36 = vpop.xlane.xlu1 %881  ;;  %v895_v3 = vadd.f32 %v876_v62, %v847_v4  ;;  %v1277_v10 = vmul.f32 0.17677669, %v1941_v45 }
 0x303   : > { %v898_v47 = vadd.f32 %v882_v36, %v850_v7  ;;  %v1248_v48 = vld [vmem:[#allocation3 + $0x40] sm:$0xff] }
 0x304   : > { %912 = vst.msk [vmem:[#allocation3 + $0x60] sm:$0xff] %vm346_vm0, %v895_v3  ;;  %1331 = vperm.xlu0 %1866, %v1277_v10   ;;  %v1251_v53 = vld [vmem:[#allocation3 + $0x58] sm:$0xff]  ;;  %1950 = vrcp.f32 %v1248_v48 }
 0x305   : > { %v1943_v39 = vpop.eup %1942  ;;  %915 = vst.msk [vmem:[#allocation3 + $0x78] sm:$0xff] %vm346_vm0, %v898_v47  ;;  %v880_v16 = vpop.xlane.xlu0 %879  ;;  %1952 = vrcp.f32 %v1251_v53 }
 0x306   : > { %v897_v55 = vadd.f32 %v880_v16, %v849_v35  ;;  %v1276_v24 = vmul.f32 0.17677669, %v1943_v39  ;;  %v940_v11 = vpop.permute.xlu1 %939 }
 0x307   : > { %v1250_v28 = vld [vmem:[#allocation3 + $0x50] sm:$0xff]  ;;  %v1013_v45 = vmul.f32 0.0, %v940_v11 }
 0x308   : > { %914 = vst.msk [vmem:[#allocation3 + $0x70] sm:$0xff] %vm346_vm0, %v897_v55  ;;  %1326 = vperm.xlu1 %1867, %v1276_v24   ;;  %v1253_v40 = vld [vmem:[#allocation3 + $0x68] sm:$0xff]  ;;  %1954 = vrcp.f32 %v1250_v28 }
 0x309   : > { %v1945_v21 = vpop.eup %1944  ;;  %1956 = vrcp.f32 %v1253_v40 }
 0x30a   : > { %v1279_v29 = vmul.f32 0.17677669, %v1945_v21  ;;  %v945_v38 = vpop.permute.xlu1 %944 }
 0x30b   : > { %v1252_v9 = vld [vmem:[#allocation3 + $0x60] sm:$0xff]  ;;  %v1014_v39 = vmul.f32 0.0, %v945_v38 }
 0x30c   : > { %1341 = vperm.xlu0 %1866, %v1279_v29   ;;  %v1255_v32 = vld [vmem:[#allocation3 + $0x78] sm:$0xff]  ;;  %1958 = vrcp.f32 %v1252_v9 }
 0x30d   : > { %v1947_v14 = vpop.eup %1946  ;;  %1960 = vrcp.f32 %v1255_v32  ;;  %v935_v27 = vpop.permute.xlu0 %934 }
 0x30e   : > { %v1949_v18 = vpop.eup %1948  ;;  %v1278_v26 = vmul.f32 0.17677669, %v1947_v14  ;;  %v955_v49 = vpop.permute.xlu1 %954  ;;  %v1012_v58 = vmul.f32 0.0, %v935_v27 }
 0x30f   : > { %v1281_v33 = vmul.f32 0.17677669, %v1949_v18  ;;  %v1254_v12 = vld [vmem:[#allocation3 + $0x70] sm:$0xff]  ;;  %v1016_v14 = vmul.f32 0.0, %v955_v49 }
 0x310   : > { %1336 = vperm.xlu1 %1867, %v1278_v26   ;;  %1962 = vrcp.f32 %v1254_v12 }
 0x311   : > { %v1951_v19 = vpop.eup %1950  ;;  %1351 = vperm.xlu0 %1866, %v1281_v33   ;;  %v950_v50 = vpop.permute.xlu0 %949 }
 0x312   : > { %v1953_v34 = vpop.eup %1952  ;;  %v1280_v37 = vmul.f32 0.17677669, %v1951_v19  ;;  %v965_v59 = vpop.permute.xlu1 %964  ;;  %v1015_v10 = vmul.f32 0.0, %v950_v50 }
 0x313   : > { %v1283_v52 = vmul.f32 0.17677669, %v1953_v34 }
 0x314   : > { %1346 = vperm.xlu1 %1867, %v1280_v37   ;;  %v1765_v54 = vpop.f32.mrf.mxu1 }
 0x315   : > { %v1955_v30 = vpop.eup %1954  ;;  %1361 = vperm.xlu0 %1866, %v1283_v52   ;;  %v960_v31 = vpop.permute.xlu0 %959  ;;  %v1190_v17 = vadd.f32 %v1765_v54, %v1013_v45 }
 0x316   : > { %v1957_v42 = vpop.eup %1956  ;;  %v1282_v56 = vmul.f32 0.17677669, %v1955_v30  ;;  %v975_v5 = vpop.permute.xlu1 %974  ;;  %v1017_v40 = vmul.f32 0.0, %v960_v31 }
 0x317   : > { %v1285_v6 = vmul.f32 0.17677669, %v1957_v42  ;;  %v1110_v61 = vpop.f32.mrf.mxu1  ;;  %v1018_v42 = vmul.f32 0.0, %v965_v59 }
 0x318   : > { %1356 = vperm.xlu1 %1867, %v1282_v56   ;;  %v1189_v2 = vadd.f32 %v1110_v61, %v1012_v58 }
 0x319   : > { %v1959_v20 = vpop.eup %1958  ;;  %1371 = vperm.xlu0 %1866, %v1285_v6   ;;  %v970_v25 = vpop.permute.xlu0 %969 }
 0x31a   : > { %v1961_v46 = vpop.eup %1960  ;;  %v1284_v60 = vmul.f32 0.17677669, %v1959_v20  ;;  %v2771_v23 = vpop.permute.xlu1 %984  ;;  %v1019_v19 = vmul.f32 0.0, %v970_v25 }
 0x31b   : > { %v1287_v8 = vmul.f32 0.17677669, %v1961_v46  ;;  %v1022_v25 = vmul.f32 0.0, %v2771_v23 }
 0x31c   : > { %1366 = vperm.xlu1 %1867, %v1284_v60  }
 0x31d   : > { %v1963_v22 = vpop.eup %1962  ;;  %1381 = vperm.xlu0 %1866, %v1287_v8   ;;  %v980_v41 = vpop.permute.xlu0 %979 }
 0x31e   : > { %v1286_v0 = vmul.f32 0.17677669, %v1963_v22  ;;  %v2773_v1 = vpop.permute.xlu1 %994  ;;  %v1768_v51 = vpop.f32.mrf.mxu1  ;;  %v1021_v6 = vmul.f32 0.0, %v980_v41  ;;  %v1020_v22 = vmul.f32 0.0, %v975_v5 }
 0x31f   : > { %v1192_v48 = vadd.f32 %v1768_v51, %v1015_v10 }
 0x320   : > { %1376 = vperm.xlu1 %1867, %v1286_v0   ;;  %v1120_v43 = vpop.f32.mrf.mxu1 }
 0x321   : > { %v990_v15 = vpop.permute.xlu0 %989  ;;  %v1191_v55 = vadd.f32 %v1120_v43, %v1014_v39 }
 0x322   : > { %v2777_v63 = vpop.permute.xlu1 %1004  ;;  %v1023_v27 = vmul.f32 0.0, %v990_v15 }
 0x325   : > { %v2775_v44 = vpop.permute.xlu0 %999  ;;  %v1771_v13 = vpop.f32.mrf.mxu1 }
 0x326   : > { %v1194_v29 = vadd.f32 %v1771_v13, %v1017_v40  ;;  %v1025_v61 = vmul.f32 0.0, %v2775_v44  ;;  %v1024_v13 = vmul.f32 0.0, %v2773_v1 }
 0x327   : > { %v1130_v62 = vpop.f32.mrf.mxu1 }
 0x328   : > { %v1193_v26 = vadd.f32 %v1130_v62, %v1016_v14 }
 0x329   : > { %v2779_v4 = vpop.permute.xlu0 %1009 }
 0x32a   : > { %v1027_v23 = vmul.f32 0.0, %v2779_v4 }
 0x32d   : > { %v1774_v36 = vpop.f32.mrf.mxu1 }
 0x32e   : > { %v1196_v37 = vadd.f32 %v1774_v36, %v1019_v19  ;;  %v1026_v36 = vmul.f32 0.0, %v2777_v63 }
 0x32f   : > { %v1140_v35 = vpop.f32.mrf.mxu1 }
 0x330   : > { %v1195_v20 = vadd.f32 %v1140_v35, %v1018_v42 }
 0x331   : > { %v1777_v24 = vpop.f32.mrf.mxu1 }
 0x332   : > { %v1198_v46 = vadd.f32 %v1777_v24, %v1021_v6 }
 0x333   : > { %v1150_v9 = vpop.f32.mrf.mxu1 }
 0x334   : > { %v1197_v50 = vadd.f32 %v1150_v9, %v1020_v22 }
 0x335   : > { %v1780_v33 = vpop.f32.mrf.mxu1 }
 0x336   : > { %v1200_v49 = vadd.f32 %v1780_v33, %v1023_v27 }
 0x337   : > { %v1160_v52 = vpop.f32.mrf.mxu1 }
 0x338   : > { %v1199_v51 = vadd.f32 %v1160_v52, %v1022_v25 }
 0x339   : > { %v1783_v60 = vpop.f32.mrf.mxu1 }
 0x33a   : > { %v1202_v15 = vadd.f32 %v1783_v60, %v1025_v61 }
 0x33b   : > { %v1170_v31 = vpop.f32.mrf.mxu1 }
 0x33c   : > { %v1201_v44 = vadd.f32 %v1170_v31, %v1024_v13 }
 0x33d   : > { %v1786_v43 = vpop.f32.mrf.mxu1 }
 0x33f   : > { %v1180_v62 = vpop.f32.mrf.mxu1 }
 0x36f   : > { %v1307_v57 = vpop.permute.xlu1 %1306 }
 0x370   : > { %v1384_v7 = vmul.f32 %v1307_v57, %v1189_v2 }
 0x372   : > { %1400 = vst [vmem:[%s2782_s13] sm:$0xff] %v1384_v7  ;;  %v1204_v7 = vadd.f32 %v1786_v43, %v1027_v23 }
 0x373   : > { %v1312_v3 = vpop.permute.xlu0 %1311 }
 0x374   : > { %v1385_v47 = vmul.f32 %v1312_v3, %v1190_v17 }
 0x376   : > { %1401 = vst [vmem:[%s2782_s13 + $0x8] sm:$0xff] %v1385_v47  ;;  %v1203_v47 = vadd.f32 %v1180_v62, %v1026_v36 }
 0x377   : > { %v1322_v53 = vpop.permute.xlu0 %1321 }
 0x378   : > { %v1387_v16 = vmul.f32 %v1322_v53, %v1192_v48 }
 0x37a   : > { %1403 = vst [vmem:[%s2782_s13 + $0x18] sm:$0xff] %v1387_v16 }
 0x37b   : > { %v1317_v28 = vpop.permute.xlu1 %1316 }
 0x37c   : > { %v1386_v21 = vmul.f32 %v1317_v28, %v1191_v55 }
 0x37e   : > { %1402 = vst [vmem:[%s2782_s13 + $0x10] sm:$0xff] %v1386_v21 }
 0x37f   : > { %v1332_v32 = vpop.permute.xlu0 %1331 }
 0x380   : > { %v1389_v18 = vmul.f32 %v1332_v32, %v1194_v29 }
 0x382   : > { %1405 = vst [vmem:[%s2782_s13 + $0x28] sm:$0xff] %v1389_v18 }
 0x383   : > { %v1327_v12 = vpop.permute.xlu1 %1326 }
 0x384   : > { %v1388_v34 = vmul.f32 %v1327_v12, %v1193_v26 }
 0x386   : > { %1404 = vst [vmem:[%s2782_s13 + $0x20] sm:$0xff] %v1388_v34 }
 0x387   : > { %v1342_v30 = vpop.permute.xlu0 %1341 }
 0x388   : > { %v1391_v56 = vmul.f32 %v1342_v30, %v1196_v37 }
 0x38a   : > { %1407 = vst [vmem:[%s2782_s13 + $0x38] sm:$0xff] %v1391_v56 }
 0x38b   : > { %v1337_v8 = vpop.permute.xlu1 %1336 }
 0x38c   : > { %v1352_v0 = vpop.permute.xlu0 %1351  ;;  %v1390_v11 = vmul.f32 %v1337_v8, %v1195_v20 }
 0x38d   : > { %v1393_v38 = vmul.f32 %v1352_v0, %v1198_v46 }
 0x38e   : > { %1406 = vst [vmem:[%s2782_s13 + $0x30] sm:$0xff] %v1390_v11 }
 0x38f   : > { %1409 = vst [vmem:[%s2782_s13 + $0x48] sm:$0xff] %v1393_v38  ;;  %v1347_v59 = vpop.permute.xlu1 %1346 }
 0x390   : > { %v1362_v41 = vpop.permute.xlu0 %1361  ;;  %v1392_v54 = vmul.f32 %v1347_v59, %v1197_v50 }
 0x391   : > { %v1395_v5 = vmul.f32 %v1362_v41, %v1200_v49 }
 0x392   : > { %1408 = vst [vmem:[%s2782_s13 + $0x40] sm:$0xff] %v1392_v54 }
 0x393   : > { %1411 = vst [vmem:[%s2782_s13 + $0x58] sm:$0xff] %v1395_v5  ;;  %v1357_v58 = vpop.permute.xlu1 %1356 }
 0x394   : > { %v1372_v2 = vpop.permute.xlu0 %1371  ;;  %v1394_v57 = vmul.f32 %v1357_v58, %v1199_v51 }
 0x395   : > { %v1397_v45 = vmul.f32 %v1372_v2, %v1202_v15 }
 0x396   : > { %1410 = vst [vmem:[%s2782_s13 + $0x50] sm:$0xff] %v1394_v57 }
 0x397   : > { %1413 = vst [vmem:[%s2782_s13 + $0x68] sm:$0xff] %v1397_v45  ;;  %v1367_v17 = vpop.permute.xlu1 %1366 }
 0x398   : > { %v1382_v3 = vpop.permute.xlu0 %1381  ;;  %v1396_v1 = vmul.f32 %v1367_v17, %v1201_v44 }
 0x399   : > { %v1399_v10 = vmul.f32 %v1382_v3, %v1204_v7 }
 0x39a   : > { %1412 = vst [vmem:[%s2782_s13 + $0x60] sm:$0xff] %v1396_v1 }
 0x39b   : > { %1415 = vst [vmem:[%s2782_s13 + $0x78] sm:$0xff] %v1399_v10  ;;  %v1377_v4 = vpop.permute.xlu1 %1376 }
 0x39c   : > { %v1398_v63 = vmul.f32 %v1377_v4, %v1203_v47 }
 0x39e   : > { %1414 = vst [vmem:[%s2782_s13 + $0x70] sm:$0xff] %v1398_v63 }
 0x39f   : > { %2061 = shalt.err (!%p2058_p12)
}
 0x3a0   : > { %s2062_s5 = scalar_lea.hbm %s2809_s25, 2048  ;;  %s2066_s14 = scalar_lea.hbm %s2864_s4, 4096 }
 0x3a1   : > { %p2063_p1 = scmp.ne.s32.totalorder %s2809_s25, %s2062_s5  ;;  %p2067_p6 = scmp.lt.s32.totalorder %s2809_s25, %s2864_s4 }
 0x3a2   : > { %p2068_p7 = scmp.lt.s32.totalorder %s2066_s14, %s2062_s5 }
 0x3a3   : > { %p2064_p2 = pnand %p2063_p1, %p2225_p9 }
 0x3a4   : > { %p2069_p8 = por %p2068_p7, %p2067_p6 }
 0x3a5   : > { %p2065_p5 = pneg %p2064_p2 }
 0x3a7   : > { %p2070_p0 = pnand %p2069_p8, %p2065_p5 }
 0x3a9   : > { %2073 = shalt.err (!%p2070_p0)
}
 0x3aa   : > { %s2143_s22 = smov 128   ;;  %s2144_s21 = smov 8  }
 0x3ab   : > { %1793 = dma.vmem_to_hbm [thread:$0]  (%p2225_p9), %s2811_s1, 2048, %s2809_s25, %s1417_s11, %s2143_s22, %s2143_s22, %s2144_s21  }
 0x3ac PF: > { %s1447_s9 = sand.u32 1, %s2112_s15   ;;  %p2899_p3 = scmp.ge.s32.totalorder %s2132_s20, 2 }
 0x3ad   : > { %s1448_s13 = scalar_lea.sflag [#allocation7], %s1447_s9 }
 0x3ae   : > { %p1806_p4 = pnand %p2899_p3, %p2232_p11 }
 0x3b0   : > { %p1807_p10 = pneg %p1806_p4 }
 0x3b2   : > { %2107 = dma.done.wait (%p1807_p10), %s1448_s13, 2048  }
 0x3b3   : > { %2109 = vsyncadd (%p1807_p10), %s1448_s13, 4294965248  ;;  %s23_s20 = sadd.s32 1, %s2132_s20   ;;  %s2900_s28 = sld [smem:[#allocation17_spill]] }
 0x3b4   : > { %p20_p13 = scmp.ge.s32.totalorder %s23_s20, 4   ;;  %s2901_s18 = sld [smem:[#allocation15_spill]] }
 0x3b5   : > { %s2902_s19 = sld [smem:[#allocation16_spill]]  ;;  %s2903_s15 = smov %s2116_s16 }
 0x3b6   : > { %s2904_s16 = smov %s2120_s17  ;;  %22 = sbr.rel (!%p20_p13) target bundleno = 10 (0xa), region = 116 }
 0x3b9   : > { %s2905_s17 = smov %s2900_s28 }
 0x3bb   :  { %1453 = vsyncpa [#allocation6], 1 }
 0x3bc   :  { %1455 = vsyncpa [#allocation6 + $0x1], 1 }
 0x3bd   :  { %1456 = vsyncpa [#allocation9], 1 }
 0x3be   :  { %1458 = vsyncpa [#allocation9 + $0x1], 1 }
 0x3bf   :  { %1459 = vsyncpa [#allocation7], 1 }
 0x3c0   :  { %1461 = vsyncpa [#allocation7 + $0x1], 1 }

</bundles_post_ra>
